<compile_context>
chip_gen: v7x
topology: tpu7x:2x2x1
jax: 0.10.0
libtpu: 0.0.40
codegen_flags: <defaults>
</compile_context>

<pallas_src>
import functools

import jax
import jax.numpy as jnp
from jax import lax
from jax.experimental import pallas as pl
from jax.experimental.pallas import tpu as pltpu

_LANE = 128
_MM_DTYPE = jnp.bfloat16   # MXU operand dtype (f32 accumulation). Set jnp.float32 for
                           # bit-tight numerics; bf16 is native on v5e/v6e/v7x MXUs.


def _round_up(x, m):
    return ((x + m - 1) // m) * m


# ---------------------------------------------------------------------------
# Fused decoder-block kernel: one batch element (whole sequence) per grid step.
# All feature axes are lane-padded to Dp (multiple of 128); padded columns stay
# exactly zero end-to-end (zero-padded weights/gammas/betas).
# ---------------------------------------------------------------------------
def _decoder_block_kernel(
        x_ref, enc_ref,
        ln0_g_ref, ln0_b_ref,
        wq1_ref, bq1_ref, wkv1_ref, bkv1_ref, wo1_ref, bo1_ref,
        ln1_g_ref, ln1_b_ref,
        wq2_ref, bq2_ref, wkv2_ref, bkv2_ref, wo2_ref, bo2_ref,
        ln2_g_ref, ln2_b_ref,
        w1_ref, b1_ref, w2_ref, b2_ref,
        o_ref, *, n_heads, d_model, eps):
    f32 = jnp.float32
    mm = wq1_ref.dtype                      # matmul operand dtype (bf16 by default)
    S, Dp = x_ref.shape[1], x_ref.shape[2]
    dh = d_model // n_heads
    scale = 1.0 / (dh ** 0.5)
    inv_f = 1.0 / d_model

    x = x_ref[0].astype(f32)                # (S, Dp), padded cols are zero
    enc = enc_ref[0].astype(f32)            # (S, Dp)

    valid = lax.broadcasted_iota(jnp.int32, (S, Dp), 1) < d_model
    # Causal (strictly-upper-triangular) mask generated in-kernel: no HBM mask traffic.
    rows = lax.broadcasted_iota(jnp.int32, (S, S), 0)
    cols = lax.broadcasted_iota(jnp.int32, (S, S), 1)
    mask_add = jnp.where(cols > rows, jnp.float32(-1e30), jnp.float32(0.0))

    def layer_norm(v, g_ref, b_ref):
        # Exact LayerNorm over the true d_model columns of the lane-padded slab.
        mu = jnp.sum(v, axis=-1, keepdims=True) * inv_f
        d = jnp.where(valid, v - mu, 0.0)
        var = jnp.sum(d * d, axis=-1, keepdims=True) * inv_f
        return d * lax.rsqrt(var + eps) * g_ref[...] + b_ref[...]

    trans_b = (((1,), (1,)), ((), ()))      # contract last dims: A @ B^T

    def mha(qn, kvn, wq_ref, bq_ref, wkv_ref, bkv_ref, wo_ref, bo_ref):
        qn_mm = qn.astype(mm)
        kvn_mm = kvn.astype(mm)
        # Fused projections: full Dp-wide MXU contractions (no per-head tiny matmuls).
        q_all = jnp.dot(qn_mm, wq_ref[...], preferred_element_type=f32) + bq_ref[...]      # (S, D)
        kv_all = jnp.dot(kvn_mm, wkv_ref[...], preferred_element_type=f32) + bkv_ref[...]  # (S, 2D)
        ctx = []
        for h in range(n_heads):            # only the head-local logits/ctx stay per-head
            lo = h * dh
            qh = q_all[:, lo:lo + dh].astype(mm)
            kh = kv_all[:, lo:lo + dh].astype(mm)
            vh = kv_all[:, d_model + lo:d_model + lo + dh].astype(mm)
            logits = lax.dot_general(qh, kh, trans_b, preferred_element_type=f32)
            logits = logits * scale + mask_add
            m = jnp.max(logits, axis=-1, keepdims=True)
            e = jnp.exp(logits - m)
            # TODO(synk): attention dropout (p=0.2) is eval-mode identity here.
            probs = e * pl.reciprocal(jnp.sum(e, axis=-1, keepdims=True), approx=True)
            ctx.append(jnp.dot(probs.astype(mm), vh, preferred_element_type=f32))           # (S, dh)
        ctx = jnp.concatenate(ctx, axis=-1)                                                 # (S, D)
        # Single full-output-width (lane-dense) output projection.
        return jnp.dot(ctx.astype(mm), wo_ref[...], preferred_element_type=f32) + bo_ref[...]

    # 1) self-attention block: LN -> masked MHA -> + LN(x)
    out_norm = layer_norm(x, ln0_g_ref, ln0_b_ref)
    out_atten = mha(out_norm, out_norm, wq1_ref, bq1_ref, wkv1_ref, bkv1_ref,
                    wo1_ref, bo1_ref) + out_norm
    # 2) cross-attention block: LN1(q), LN1(kv) -> masked MHA -> + LN1(q)
    q_norm = layer_norm(out_atten, ln1_g_ref, ln1_b_ref)
    kv_norm = layer_norm(enc, ln1_g_ref, ln1_b_ref)
    out_atten2 = mha(q_norm, kv_norm, wq2_ref, bq2_ref, wkv2_ref, bkv2_ref,
                     wo2_ref, bo2_ref) + q_norm
    # 3) FFN block: LN2 -> Linear -> ReLU -> Dropout(eval) -> Linear -> + LN2 output
    y = layer_norm(out_atten2, ln2_g_ref, ln2_b_ref)
    h = jnp.maximum(jnp.dot(y.astype(mm), w1_ref[...], preferred_element_type=f32)
                    + b1_ref[...], 0.0)
    # TODO(synk): FFN dropout (p=0.2) is eval-mode identity (no train-mode PRNG mask).
    ffn = jnp.dot(h.astype(mm), w2_ref[...], preferred_element_type=f32) + b2_ref[...]
    o_ref[0] = (ffn + y).astype(o_ref.dtype)


# ---------------------------------------------------------------------------
# One-time weight formatting (pad / transpose / cast) done OUTSIDE the step fn.
# ---------------------------------------------------------------------------
def prepare_decoder_params(params, n_heads, n_dims, mm_dtype=_MM_DTYPE):
    D = n_dims
    Dp = _round_up(D, _LANE)
    pad_c = Dp - D
    f32 = jnp.float32
    p = params

    def table(t):                       # (n, D) -> (n, Dp), zero lane padding
        return jnp.pad(t.astype(f32), ((0, 0), (0, pad_c)))

    def vec(v):                         # (D,) -> (1, Dp) f32, zero lane padding
        return jnp.pad(v.astype(f32), (0, pad_c)).reshape(1, Dp)

    def mha_weights(in_w, in_b, out_w, out_b):
        # PyTorch layouts: in_w (3D, D), out_w (D, D); y = x @ W^T + b.
        wq = jnp.pad(in_w[:D].T.astype(f32), ((0, pad_c), (0, 0))).astype(mm_dtype)    # (Dp, D)
        wkv = jnp.pad(in_w[D:].T.astype(f32), ((0, pad_c), (0, 0))).astype(mm_dtype)   # (Dp, 2D)
        bq = in_b[:D].astype(f32).reshape(1, D)
        bkv = in_b[D:].astype(f32).reshape(1, 2 * D)
        wo = jnp.pad(out_w.T.astype(f32), ((0, 0), (0, pad_c))).astype(mm_dtype)       # (D, Dp)
        return wq, bq, wkv, bkv, wo, vec(out_b)

    def ffn_weights(w, b):              # (D, D) -> (Dp, Dp) + (1, Dp)
        return (jnp.pad(w.T.astype(f32), ((0, pad_c), (0, pad_c))).astype(mm_dtype), vec(b))

    prep = {
        "response_embed": table(p["response_embed"]),
        "etime_embed": table(p["etime_embed"]),
        "ltime_embed": table(p["ltime_embed"]),
        "position_embed": table(p["position_embed"]),
        "ln0_g": vec(p["ln0_g"]), "ln0_b": vec(p["ln0_b"]),
        "ln1_g": vec(p["ln1_g"]), "ln1_b": vec(p["ln1_b"]),
        "ln2_g": vec(p["ln2_g"]), "ln2_b": vec(p["ln2_b"]),
    }
    (prep["wq1"], prep["bq1"], prep["wkv1"], prep["bkv1"], prep["wo1"], prep["bo1"]
     ) = mha_weights(p["mha1_in_w"], p["mha1_in_b"], p["mha1_out_w"], p["mha1_out_b"])
    (prep["wq2"], prep["bq2"], prep["wkv2"], prep["bkv2"], prep["wo2"], prep["bo2"]
     ) = mha_weights(p["mha2_in_w"], p["mha2_in_b"], p["mha2_out_w"], p["mha2_out_b"])
    prep["w1"], prep["b1"] = ffn_weights(p["ffn_w1"], p["ffn_b1"])
    prep["w2"], prep["b2"] = ffn_weights(p["ffn_w2"], p["ffn_b2"])
    return prep


# ---------------------------------------------------------------------------
# DecoderBlock forward (Pallas)
# ---------------------------------------------------------------------------
def decoder_block_forward(prep, input_r, encoder_output, e_time, l_time, *,
                          n_heads, n_dims, first_block=True, eps=1e-5):
    D = n_dims
    Dp = prep["ln0_g"].shape[-1]
    f32 = jnp.float32

    if first_block:
        S = input_r.shape[1]
        # TODO(synk): embedding gathers (data-dependent row lookups) stay in plain JAX;
        # tables are pre-padded to Dp so the summed activations are already lane-dense.
        x = (prep["response_embed"][input_r]
             + prep["etime_embed"][e_time]
             + prep["ltime_embed"][l_time]
             + prep["position_embed"][jnp.arange(S)][None])
    else:
        x = jnp.pad(input_r.astype(f32), ((0, 0), (0, 0), (0, Dp - D)))
    B, S, _ = x.shape
    assert encoder_output.shape[0] == B and encoder_output.shape[1] == S, (
        "cross-attention assumes the encoder output length matches the decoder length")
    enc = jnp.pad(encoder_output.astype(f32), ((0, 0), (0, 0), (0, Dp - D)))

    weights = (prep["ln0_g"], prep["ln0_b"],
               prep["wq1"], prep["bq1"], prep["wkv1"], prep["bkv1"], prep["wo1"], prep["bo1"],
               prep["ln1_g"], prep["ln1_b"],
               prep["wq2"], prep["bq2"], prep["wkv2"], prep["bkv2"], prep["wo2"], prep["bo2"],
               prep["ln2_g"], prep["ln2_b"],
               prep["w1"], prep["b1"], prep["w2"], prep["b2"])

    batch_spec = pl.BlockSpec((1, S, Dp), lambda i: (i, 0, 0))

    def const_spec(a):  # grid-invariant operand: whole array, constant index_map
        return pl.BlockSpec(a.shape, lambda i: (0,) * a.ndim)

    weight_bytes = sum(int(w.size) * w.dtype.itemsize for w in weights)
    act_bytes = 4 * 3 * B * S * Dp                     # two f32 inputs + one f32 output
    flops = B * (16 * S * Dp * D + 8 * S * S * D + 4 * S * Dp * Dp)
    transcendentals = B * (2 * n_heads * S * S + 2 * n_heads * S + 3 * S)
    cost = pl.CostEstimate(flops=int(flops), transcendentals=int(transcendentals),
                           bytes_accessed=int(act_bytes + weight_bytes))

    # Per-generation VMEM budget: 0.75x physical per-core VMEM (~96 MiB v5e/v6e, ~48 MiB
    # v7x), never below a 16 MiB floor so the compiler keeps internal-scratch headroom.
    try:
        vmem_cap = int(pltpu.get_tpu_info().vmem_capacity_bytes)
    except Exception:
        vmem_cap = 64 * 1024 * 1024
    vmem_req = 2 * (3 * 2 * S * Dp * 4 + 2 * weight_bytes)
    vmem_limit = int(min(max(vmem_req, 16 * 1024 * 1024), 0.75 * vmem_cap))

    kernel = functools.partial(_decoder_block_kernel,
                               n_heads=n_heads, d_model=D, eps=eps)

    out = pl.pallas_call(
        kernel,
        out_shape=jax.ShapeDtypeStruct((B, S, Dp), f32),
        grid_spec=pltpu.PrefetchScalarGridSpec(
            num_scalar_prefetch=0,
            grid=(B,),
            in_specs=[batch_spec, batch_spec] + [const_spec(w) for w in weights],
            out_specs=batch_spec,
        ),
        compiler_params=pltpu.CompilerParams(
            dimension_semantics=("parallel",),
            vmem_limit_bytes=vmem_limit,
        ),
        cost_estimate=cost,
    )(x, enc, *weights)

    return out[:, :, :D].astype(encoder_output.dtype)


# ---------------------------------------------------------------------------
# Pure-JAX f32 reference (mirrors the PyTorch module) and parameter init
# ---------------------------------------------------------------------------
def _layer_norm_ref(x, gamma, beta, eps=1e-5):
    mu = jnp.mean(x, axis=-1, keepdims=True)
    var = jnp.mean((x - mu) ** 2, axis=-1, keepdims=True)
    return (x - mu) * lax.rsqrt(var + eps) * gamma + beta


def _mha_ref(q, kv, in_w, in_b, out_w, out_b, n_heads, mask_add):
    B, S, D = q.shape
    Skv = kv.shape[1]
    dh = D // n_heads
    hi = lax.Precision.HIGHEST
    wq, wk, wv = in_w[:D], in_w[D:2 * D], in_w[2 * D:]
    bq, bk, bv = in_b[:D], in_b[D:2 * D], in_b[2 * D:]
    Q = jnp.einsum("bsd,ed->bse", q, wq, precision=hi) + bq
    K = jnp.einsum("bsd,ed->bse", kv, wk, precision=hi) + bk
    V = jnp.einsum("bsd,ed->bse", kv, wv, precision=hi) + bv
    Qh = Q.reshape(B, S, n_heads, dh)
    Kh = K.reshape(B, Skv, n_heads, dh)
    Vh = V.reshape(B, Skv, n_heads, dh)
    s = jnp.einsum("bqhd,bkhd->bhqk", Qh, Kh, precision=hi) / (dh ** 0.5)
    s = s + mask_add[None, None]
    w = jax.nn.softmax(s, axis=-1)
    ctx = jnp.einsum("bhqk,bkhd->bqhd", w, Vh, precision=hi).reshape(B, S, D)
    return jnp.einsum("bsd,ed->bse", ctx, out_w, precision=hi) + out_b


def decoder_block_reference(params, input_r, encoder_output, e_time, l_time,
                            n_heads, first_block=True):
    p = params
    hi = lax.Precision.HIGHEST
    if first_block:
        S = input_r.shape[1]
        out = (p["response_embed"][input_r] + p["etime_embed"][e_time]
               + p["ltime_embed"][l_time] + p["position_embed"][jnp.arange(S)][None])
    else:
        out = input_r
    S = out.shape[1]
    mask_add = jnp.where(jnp.triu(jnp.ones((S, S), dtype=bool), k=1),
                         jnp.float32(-1e30), jnp.float32(0.0))

    out_norm = _layer_norm_ref(out, p["ln0_g"], p["ln0_b"])
    out_atten = _mha_ref(out_norm, out_norm, p["mha1_in_w"], p["mha1_in_b"],
                         p["mha1_out_w"], p["mha1_out_b"], n_heads, mask_add) + out_norm

    q_norm = _layer_norm_ref(out_atten, p["ln1_g"], p["ln1_b"])
    kv_norm = _layer_norm_ref(encoder_output, p["ln1_g"], p["ln1_b"])
    out_atten2 = _mha_ref(q_norm, kv_norm, p["mha2_in_w"], p["mha2_in_b"],
                          p["mha2_out_w"], p["mha2_out_b"], n_heads, mask_add) + q_norm

    output_norm = _layer_norm_ref(out_atten2, p["ln2_g"], p["ln2_b"])
    h = jnp.maximum(jnp.einsum("bsd,ed->bse", output_norm, p["ffn_w1"], precision=hi)
                    + p["ffn_b1"], 0.0)
    ffn_out = jnp.einsum("bsd,ed->bse", h, p["ffn_w2"], precision=hi) + p["ffn_b2"]
    return ffn_out + output_norm


def init_decoder_params(key, n_heads, n_dims, total_responses, seq_len):
    D = n_dims
    keys = iter(jax.random.split(key, 22))

    def emb(n):
        return 0.1 * jax.random.normal(next(keys), (n, D), jnp.float32)

    def linear(out_d, in_d):
        bound = 1.0 / (in_d ** 0.5)
        w = jax.random.uniform(next(keys), (out_d, in_d), jnp.float32, -bound, bound)
        b = jax.random.uniform(next(keys), (out_d,), jnp.float32, -bound, bound)
        return w, b

    p = {
        "response_embed": emb(total_responses),
        "etime_embed": emb(301),
        "ltime_embed": emb(1441),
        "position_embed": emb(seq_len),
    }
    for name in ("ln0", "ln1", "ln2"):
        p[f"{name}_g"] = 1.0 + 0.1 * jax.random.normal(next(keys), (D,), jnp.float32)
        p[f"{name}_b"] = 0.1 * jax.random.normal(next(keys), (D,), jnp.float32)
    for name in ("mha1", "mha2"):
        p[f"{name}_in_w"], p[f"{name}_in_b"] = linear(3 * D, D)
        p[f"{name}_out_w"], p[f"{name}_out_b"] = linear(D, D)
    p["ffn_w1"], p["ffn_b1"] = linear(D, D)
    p["ffn_w2"], p["ffn_b2"] = linear(D, D)
    return p


if __name__ == "__main__":
    key = jax.random.PRNGKey(0)
    k_params, k_r, k_e, k_l, k_enc = jax.random.split(key, 5)

    n_heads, n_dims, total_responses, seq_len = 4, 32, 100, 9
    batch = 2
    S = seq_len - 1          # the DecoderBlock consumes sequences of length seq_len - 1

    params = init_decoder_params(k_params, n_heads, n_dims, total_responses, seq_len)
    prep = prepare_decoder_params(params, n_heads, n_dims)   # once, outside the step fn

    input_r = jax.random.randint(k_r, (batch, S), 0, total_responses)
    e_time = jax.random.randint(k_e, (batch, S), 0, 301)
    l_time = jax.random.randint(k_l, (batch, S), 0, 1441)
    encoder_output = jax.random.normal(k_enc, (batch, S, n_dims), jnp.float32)

    fwd = jax.jit(decoder_block_forward,
                  static_argnames=("n_heads", "n_dims", "first_block"))
    out = fwd(prep, input_r, encoder_output, e_time, l_time,
              n_heads=n_heads, n_dims=n_dims, first_block=True)
    out = jax.block_until_ready(out)

    ref = decoder_block_reference(params, input_r, encoder_output, e_time, l_time,
                                  n_heads=n_heads, first_block=True)
    assert out.shape == (batch, S, n_dims), out.shape
    max_err = float(jnp.max(jnp.abs(out.astype(jnp.float32) - ref)))
    # bf16 MXU operands (f32 accumulation) vs f32 reference -> relative tolerance;
    # with _MM_DTYPE = jnp.float32 the same comparison passes at ~2e-3 absolute.
    if _MM_DTYPE == jnp.float32:
        tol = 2e-3
    else:
        tol = 2e-3 + 4e-2 * float(jnp.max(jnp.abs(ref)))
    assert max_err < tol, f"mismatch vs reference: max_err={max_err} (tol={tol})"
    print("KERNEL_OK")
</pallas_src>

<mosaic_0001>
module attributes {stable_mosaic.version = 11 : i64} {
  func.func @_decoder_block_kernel(%arg0: i32, %arg1: memref<1x8x128xf32, #tpu.memory_space<vmem>>, %arg2: memref<1x8x128xf32, #tpu.memory_space<vmem>>, %arg3: memref<1x128xf32, #tpu.memory_space<vmem>>, %arg4: memref<1x128xf32, #tpu.memory_space<vmem>>, %arg5: memref<128x32xbf16, #tpu.memory_space<vmem>>, %arg6: memref<1x32xf32, #tpu.memory_space<vmem>>, %arg7: memref<128x64xbf16, #tpu.memory_space<vmem>>, %arg8: memref<1x64xf32, #tpu.memory_space<vmem>>, %arg9: memref<32x128xbf16, #tpu.memory_space<vmem>>, %arg10: memref<1x128xf32, #tpu.memory_space<vmem>>, %arg11: memref<1x128xf32, #tpu.memory_space<vmem>>, %arg12: memref<1x128xf32, #tpu.memory_space<vmem>>, %arg13: memref<128x32xbf16, #tpu.memory_space<vmem>>, %arg14: memref<1x32xf32, #tpu.memory_space<vmem>>, %arg15: memref<128x64xbf16, #tpu.memory_space<vmem>>, %arg16: memref<1x64xf32, #tpu.memory_space<vmem>>, %arg17: memref<32x128xbf16, #tpu.memory_space<vmem>>, %arg18: memref<1x128xf32, #tpu.memory_space<vmem>>, %arg19: memref<1x128xf32, #tpu.memory_space<vmem>>, %arg20: memref<1x128xf32, #tpu.memory_space<vmem>>, %arg21: memref<128x128xbf16, #tpu.memory_space<vmem>>, %arg22: memref<1x128xf32, #tpu.memory_space<vmem>>, %arg23: memref<128x128xbf16, #tpu.memory_space<vmem>>, %arg24: memref<1x128xf32, #tpu.memory_space<vmem>>, %arg25: memref<1x8x128xf32, #tpu.memory_space<vmem>>) attributes {dimension_semantics = [#tpu.dimension_semantics<parallel>], iteration_bounds = array<i64: 2>, scalar_prefetch = 0 : i64, scratch_operands = 0 : i64, tpu.core_type = #tpu.core_type<tc>, window_params = [{transform_indices = @transform_0, window_bounds = array<i64: 1, 8, 128>}, {transform_indices = @transform_1, window_bounds = array<i64: 1, 8, 128>}, {pipeline_mode = #tpu.pipeline_mode<synchronous>, transform_indices = @transform_2, window_bounds = array<i64: 1, 128>}, {pipeline_mode = #tpu.pipeline_mode<synchronous>, transform_indices = @transform_3, window_bounds = array<i64: 1, 128>}, {pipeline_mode = #tpu.pipeline_mode<synchronous>, transform_indices = @transform_4, window_bounds = array<i64: 128, 32>}, {pipeline_mode = #tpu.pipeline_mode<synchronous>, transform_indices = @transform_5, window_bounds = array<i64: 1, 32>}, {pipeline_mode = #tpu.pipeline_mode<synchronous>, transform_indices = @transform_6, window_bounds = array<i64: 128, 64>}, {pipeline_mode = #tpu.pipeline_mode<synchronous>, transform_indices = @transform_7, window_bounds = array<i64: 1, 64>}, {pipeline_mode = #tpu.pipeline_mode<synchronous>, transform_indices = @transform_8, window_bounds = array<i64: 32, 128>}, {pipeline_mode = #tpu.pipeline_mode<synchronous>, transform_indices = @transform_9, window_bounds = array<i64: 1, 128>}, {pipeline_mode = #tpu.pipeline_mode<synchronous>, transform_indices = @transform_10, window_bounds = array<i64: 1, 128>}, {pipeline_mode = #tpu.pipeline_mode<synchronous>, transform_indices = @transform_11, window_bounds = array<i64: 1, 128>}, {pipeline_mode = #tpu.pipeline_mode<synchronous>, transform_indices = @transform_12, window_bounds = array<i64: 128, 32>}, {pipeline_mode = #tpu.pipeline_mode<synchronous>, transform_indices = @transform_13, window_bounds = array<i64: 1, 32>}, {pipeline_mode = #tpu.pipeline_mode<synchronous>, transform_indices = @transform_14, window_bounds = array<i64: 128, 64>}, {pipeline_mode = #tpu.pipeline_mode<synchronous>, transform_indices = @transform_15, window_bounds = array<i64: 1, 64>}, {pipeline_mode = #tpu.pipeline_mode<synchronous>, transform_indices = @transform_16, window_bounds = array<i64: 32, 128>}, {pipeline_mode = #tpu.pipeline_mode<synchronous>, transform_indices = @transform_17, window_bounds = array<i64: 1, 128>}, {pipeline_mode = #tpu.pipeline_mode<synchronous>, transform_indices = @transform_18, window_bounds = array<i64: 1, 128>}, {pipeline_mode = #tpu.pipeline_mode<synchronous>, transform_indices = @transform_19, window_bounds = array<i64: 1, 128>}, {pipeline_mode = #tpu.pipeline_mode<synchronous>, transform_indices = @transform_20, window_bounds = array<i64: 128, 128>}, {pipeline_mode = #tpu.pipeline_mode<synchronous>, transform_indices = @transform_21, window_bounds = array<i64: 1, 128>}, {pipeline_mode = #tpu.pipeline_mode<synchronous>, transform_indices = @transform_22, window_bounds = array<i64: 128, 128>}, {pipeline_mode = #tpu.pipeline_mode<synchronous>, transform_indices = @transform_23, window_bounds = array<i64: 1, 128>}, {transform_indices = @transform_24, window_bounds = array<i64: 1, 8, 128>}]} {
    %c0 = arith.constant 0 : index
    %c0_0 = arith.constant 0 : index
    %c0_1 = arith.constant 0 : index
    %0 = vector.load %arg1[%c0, %c0_0, %c0_1] : memref<1x8x128xf32, #tpu.memory_space<vmem>>, vector<1x8x128xf32>
    %1 = vector.shape_cast %0 : vector<1x8x128xf32> to vector<8x128xf32>
    %c0_2 = arith.constant 0 : index
    %c0_3 = arith.constant 0 : index
    %c0_4 = arith.constant 0 : index
    %2 = vector.load %arg2[%c0_2, %c0_3, %c0_4] : memref<1x8x128xf32, #tpu.memory_space<vmem>>, vector<1x8x128xf32>
    %3 = vector.shape_cast %2 : vector<1x8x128xf32> to vector<8x128xf32>
    %4 = tpu.iota {dimensions = array<i32: 1>} : vector<8x128xi32>
    %c32_i32 = arith.constant 32 : i32
    %5 = vector.broadcast %c32_i32 : i32 to vector<8x128xi32>
    %6 = arith.cmpi slt, %4, %5 : vector<8x128xi32>
    %7 = tpu.iota {dimensions = array<i32: 0>} : vector<8x8xi32>
    %8 = tpu.iota {dimensions = array<i32: 1>} : vector<8x8xi32>
    %9 = arith.cmpi sgt, %8, %7 : vector<8x8xi32>
    %cst = arith.constant -1.000000e+30 : f32
    %cst_5 = arith.constant 0.000000e+00 : f32
    %10 = vector.broadcast %cst : f32 to vector<8x8xf32>
    %11 = vector.broadcast %cst_5 : f32 to vector<8x8xf32>
    %12 = arith.select %9, %10, %11 : vector<8x8xi1>, vector<8x8xf32>
    %cst_6 = arith.constant dense<0.000000e+00> : vector<8xf32>
    %13 = vector.multi_reduction <add>, %1, %cst_6 [1] : vector<8x128xf32> to vector<8xf32>
    %14 = vector.shape_cast %13 : vector<8xf32> to vector<8x1xf32>
    %cst_7 = arith.constant 3.125000e-02 : f32
    %15 = vector.broadcast %cst_7 : f32 to vector<8x1xf32>
    %16 = arith.mulf %14, %15 : vector<8x1xf32>
    %17 = vector.broadcast %16 : vector<8x1xf32> to vector<8x128xf32>
    %18 = arith.subf %1, %17 : vector<8x128xf32>
    %cst_8 = arith.constant 0.000000e+00 : f32
    %19 = vector.broadcast %cst_8 : f32 to vector<8x128xf32>
    %20 = arith.select %6, %18, %19 : vector<8x128xi1>, vector<8x128xf32>
    %21 = arith.mulf %20, %20 : vector<8x128xf32>
    %cst_9 = arith.constant dense<0.000000e+00> : vector<8xf32>
    %22 = vector.multi_reduction <add>, %21, %cst_9 [1] : vector<8x128xf32> to vector<8xf32>
    %23 = vector.shape_cast %22 : vector<8xf32> to vector<8x1xf32>
    %cst_10 = arith.constant 3.125000e-02 : f32
    %24 = vector.broadcast %cst_10 : f32 to vector<8x1xf32>
    %25 = arith.mulf %23, %24 : vector<8x1xf32>
    %cst_11 = arith.constant 9.99999974E-6 : f32
    %26 = vector.broadcast %cst_11 : f32 to vector<8x1xf32>
    %27 = arith.addf %25, %26 : vector<8x1xf32>
    %28 = math.rsqrt %27 : vector<8x1xf32>
    %29 = vector.broadcast %28 : vector<8x1xf32> to vector<8x128xf32>
    %30 = arith.mulf %20, %29 : vector<8x128xf32>
    %c0_12 = arith.constant 0 : index
    %c0_13 = arith.constant 0 : index
    %31 = vector.load %arg3[%c0_12, %c0_13] : memref<1x128xf32, #tpu.memory_space<vmem>>, vector<1x128xf32>
    %32 = vector.broadcast %31 : vector<1x128xf32> to vector<8x128xf32>
    %33 = arith.mulf %30, %32 : vector<8x128xf32>
    %c0_14 = arith.constant 0 : index
    %c0_15 = arith.constant 0 : index
    %34 = vector.load %arg4[%c0_14, %c0_15] : memref<1x128xf32, #tpu.memory_space<vmem>>, vector<1x128xf32>
    %35 = vector.broadcast %34 : vector<1x128xf32> to vector<8x128xf32>
    %36 = arith.addf %33, %35 : vector<8x128xf32>
    %37 = arith.truncf %36 : vector<8x128xf32> to vector<8x128xbf16>
    %38 = arith.truncf %36 : vector<8x128xf32> to vector<8x128xbf16>
    %c0_16 = arith.constant 0 : index
    %c0_17 = arith.constant 0 : index
    %39 = vector.load %arg5[%c0_16, %c0_17] : memref<128x32xbf16, #tpu.memory_space<vmem>>, vector<128x32xbf16>
    %cst_18 = arith.constant dense<0.000000e+00> : vector<8x32xf32>
    %40 = tpu.matmul %37, %39, %cst_18 {dimension_numbers = #tpu.dot_dimension_numbers<[1], [0], [0], [1], [0, 0, 1, 1], [], []>} : vector<8x128xbf16>, vector<128x32xbf16>, vector<8x32xf32> -> vector<8x32xf32>
    %c0_19 = arith.constant 0 : index
    %c0_20 = arith.constant 0 : index
    %41 = vector.load %arg6[%c0_19, %c0_20] : memref<1x32xf32, #tpu.memory_space<vmem>>, vector<1x32xf32>
    %42 = vector.broadcast %41 : vector<1x32xf32> to vector<8x32xf32>
    %43 = arith.addf %40, %42 : vector<8x32xf32>
    %c0_21 = arith.constant 0 : index
    %c0_22 = arith.constant 0 : index
    %44 = vector.load %arg7[%c0_21, %c0_22] : memref<128x64xbf16, #tpu.memory_space<vmem>>, vector<128x64xbf16>
    %cst_23 = arith.constant dense<0.000000e+00> : vector<8x64xf32>
    %45 = tpu.matmul %38, %44, %cst_23 {dimension_numbers = #tpu.dot_dimension_numbers<[1], [0], [0], [1], [0, 0, 1, 1], [], []>} : vector<8x128xbf16>, vector<128x64xbf16>, vector<8x64xf32> -> vector<8x64xf32>
    %c0_24 = arith.constant 0 : index
    %c0_25 = arith.constant 0 : index
    %46 = vector.load %arg8[%c0_24, %c0_25] : memref<1x64xf32, #tpu.memory_space<vmem>>, vector<1x64xf32>
    %47 = vector.broadcast %46 : vector<1x64xf32> to vector<8x64xf32>
    %48 = arith.addf %45, %47 : vector<8x64xf32>
    %49 = vector.extract_strided_slice %43 {offsets = [0, 0], sizes = [8, 8], strides = [1, 1]} : vector<8x32xf32> to vector<8x8xf32>
    %50 = arith.truncf %49 : vector<8x8xf32> to vector<8x8xbf16>
    %51 = vector.extract_strided_slice %48 {offsets = [0, 0], sizes = [8, 8], strides = [1, 1]} : vector<8x64xf32> to vector<8x8xf32>
    %52 = arith.truncf %51 : vector<8x8xf32> to vector<8x8xbf16>
    %53 = vector.extract_strided_slice %48 {offsets = [0, 32], sizes = [8, 8], strides = [1, 1]} : vector<8x64xf32> to vector<8x8xf32>
    %54 = arith.truncf %53 : vector<8x8xf32> to vector<8x8xbf16>
    %cst_26 = arith.constant dense<0.000000e+00> : vector<8x8xf32>
    %55 = tpu.matmul %50, %52, %cst_26 {dimension_numbers = #tpu.dot_dimension_numbers<[1], [1], [0], [0], [0, 0, 1, 0], [], []>} : vector<8x8xbf16>, vector<8x8xbf16>, vector<8x8xf32> -> vector<8x8xf32>
    %cst_27 = arith.constant 0.353553385 : f32
    %56 = vector.broadcast %cst_27 : f32 to vector<8x8xf32>
    %57 = arith.mulf %55, %56 : vector<8x8xf32>
    %58 = arith.addf %57, %12 : vector<8x8xf32>
    %cst_28 = arith.constant dense<0xFF800000> : vector<8xf32>
    %59 = vector.multi_reduction <maximumf>, %58, %cst_28 [1] : vector<8x8xf32> to vector<8xf32>
    %60 = vector.shape_cast %59 : vector<8xf32> to vector<8x1xf32>
    %61 = vector.broadcast %60 : vector<8x1xf32> to vector<8x8xf32>
    %62 = arith.subf %58, %61 : vector<8x8xf32>
    %63 = math.exp %62 : vector<8x8xf32>
    %cst_29 = arith.constant dense<0.000000e+00> : vector<8xf32>
    %64 = vector.multi_reduction <add>, %63, %cst_29 [1] : vector<8x8xf32> to vector<8xf32>
    %65 = vector.shape_cast %64 : vector<8xf32> to vector<8x1xf32>
    %66 = tpu.reciprocal %65 {approx = true} : vector<8x1xf32> -> vector<8x1xf32>
    %67 = vector.broadcast %66 : vector<8x1xf32> to vector<8x8xf32>
    %68 = arith.mulf %63, %67 : vector<8x8xf32>
    %69 = arith.truncf %68 : vector<8x8xf32> to vector<8x8xbf16>
    %cst_30 = arith.constant dense<0.000000e+00> : vector<8x8xf32>
    %70 = tpu.matmul %69, %54, %cst_30 {dimension_numbers = #tpu.dot_dimension_numbers<[1], [0], [0], [1], [0, 0, 1, 1], [], []>} : vector<8x8xbf16>, vector<8x8xbf16>, vector<8x8xf32> -> vector<8x8xf32>
    %71 = vector.extract_strided_slice %43 {offsets = [0, 8], sizes = [8, 8], strides = [1, 1]} : vector<8x32xf32> to vector<8x8xf32>
    %72 = arith.truncf %71 : vector<8x8xf32> to vector<8x8xbf16>
    %73 = vector.extract_strided_slice %48 {offsets = [0, 8], sizes = [8, 8], strides = [1, 1]} : vector<8x64xf32> to vector<8x8xf32>
    %74 = arith.truncf %73 : vector<8x8xf32> to vector<8x8xbf16>
    %75 = vector.extract_strided_slice %48 {offsets = [0, 40], sizes = [8, 8], strides = [1, 1]} : vector<8x64xf32> to vector<8x8xf32>
    %76 = arith.truncf %75 : vector<8x8xf32> to vector<8x8xbf16>
    %cst_31 = arith.constant dense<0.000000e+00> : vector<8x8xf32>
    %77 = tpu.matmul %72, %74, %cst_31 {dimension_numbers = #tpu.dot_dimension_numbers<[1], [1], [0], [0], [0, 0, 1, 0], [], []>} : vector<8x8xbf16>, vector<8x8xbf16>, vector<8x8xf32> -> vector<8x8xf32>
    %cst_32 = arith.constant 0.353553385 : f32
    %78 = vector.broadcast %cst_32 : f32 to vector<8x8xf32>
    %79 = arith.mulf %77, %78 : vector<8x8xf32>
    %80 = arith.addf %79, %12 : vector<8x8xf32>
    %cst_33 = arith.constant dense<0xFF800000> : vector<8xf32>
    %81 = vector.multi_reduction <maximumf>, %80, %cst_33 [1] : vector<8x8xf32> to vector<8xf32>
    %82 = vector.shape_cast %81 : vector<8xf32> to vector<8x1xf32>
    %83 = vector.broadcast %82 : vector<8x1xf32> to vector<8x8xf32>
    %84 = arith.subf %80, %83 : vector<8x8xf32>
    %85 = math.exp %84 : vector<8x8xf32>
    %cst_34 = arith.constant dense<0.000000e+00> : vector<8xf32>
    %86 = vector.multi_reduction <add>, %85, %cst_34 [1] : vector<8x8xf32> to vector<8xf32>
    %87 = vector.shape_cast %86 : vector<8xf32> to vector<8x1xf32>
    %88 = tpu.reciprocal %87 {approx = true} : vector<8x1xf32> -> vector<8x1xf32>
    %89 = vector.broadcast %88 : vector<8x1xf32> to vector<8x8xf32>
    %90 = arith.mulf %85, %89 : vector<8x8xf32>
    %91 = arith.truncf %90 : vector<8x8xf32> to vector<8x8xbf16>
    %cst_35 = arith.constant dense<0.000000e+00> : vector<8x8xf32>
    %92 = tpu.matmul %91, %76, %cst_35 {dimension_numbers = #tpu.dot_dimension_numbers<[1], [0], [0], [1], [0, 0, 1, 1], [], []>} : vector<8x8xbf16>, vector<8x8xbf16>, vector<8x8xf32> -> vector<8x8xf32>
    %93 = vector.extract_strided_slice %43 {offsets = [0, 16], sizes = [8, 8], strides = [1, 1]} : vector<8x32xf32> to vector<8x8xf32>
    %94 = arith.truncf %93 : vector<8x8xf32> to vector<8x8xbf16>
    %95 = vector.extract_strided_slice %48 {offsets = [0, 16], sizes = [8, 8], strides = [1, 1]} : vector<8x64xf32> to vector<8x8xf32>
    %96 = arith.truncf %95 : vector<8x8xf32> to vector<8x8xbf16>
    %97 = vector.extract_strided_slice %48 {offsets = [0, 48], sizes = [8, 8], strides = [1, 1]} : vector<8x64xf32> to vector<8x8xf32>
    %98 = arith.truncf %97 : vector<8x8xf32> to vector<8x8xbf16>
    %cst_36 = arith.constant dense<0.000000e+00> : vector<8x8xf32>
    %99 = tpu.matmul %94, %96, %cst_36 {dimension_numbers = #tpu.dot_dimension_numbers<[1], [1], [0], [0], [0, 0, 1, 0], [], []>} : vector<8x8xbf16>, vector<8x8xbf16>, vector<8x8xf32> -> vector<8x8xf32>
    %cst_37 = arith.constant 0.353553385 : f32
    %100 = vector.broadcast %cst_37 : f32 to vector<8x8xf32>
    %101 = arith.mulf %99, %100 : vector<8x8xf32>
    %102 = arith.addf %101, %12 : vector<8x8xf32>
    %cst_38 = arith.constant dense<0xFF800000> : vector<8xf32>
    %103 = vector.multi_reduction <maximumf>, %102, %cst_38 [1] : vector<8x8xf32> to vector<8xf32>
    %104 = vector.shape_cast %103 : vector<8xf32> to vector<8x1xf32>
    %105 = vector.broadcast %104 : vector<8x1xf32> to vector<8x8xf32>
    %106 = arith.subf %102, %105 : vector<8x8xf32>
    %107 = math.exp %106 : vector<8x8xf32>
    %cst_39 = arith.constant dense<0.000000e+00> : vector<8xf32>
    %108 = vector.multi_reduction <add>, %107, %cst_39 [1] : vector<8x8xf32> to vector<8xf32>
    %109 = vector.shape_cast %108 : vector<8xf32> to vector<8x1xf32>
    %110 = tpu.reciprocal %109 {approx = true} : vector<8x1xf32> -> vector<8x1xf32>
    %111 = vector.broadcast %110 : vector<8x1xf32> to vector<8x8xf32>
    %112 = arith.mulf %107, %111 : vector<8x8xf32>
    %113 = arith.truncf %112 : vector<8x8xf32> to vector<8x8xbf16>
    %cst_40 = arith.constant dense<0.000000e+00> : vector<8x8xf32>
    %114 = tpu.matmul %113, %98, %cst_40 {dimension_numbers = #tpu.dot_dimension_numbers<[1], [0], [0], [1], [0, 0, 1, 1], [], []>} : vector<8x8xbf16>, vector<8x8xbf16>, vector<8x8xf32> -> vector<8x8xf32>
    %115 = vector.extract_strided_slice %43 {offsets = [0, 24], sizes = [8, 8], strides = [1, 1]} : vector<8x32xf32> to vector<8x8xf32>
    %116 = arith.truncf %115 : vector<8x8xf32> to vector<8x8xbf16>
    %117 = vector.extract_strided_slice %48 {offsets = [0, 24], sizes = [8, 8], strides = [1, 1]} : vector<8x64xf32> to vector<8x8xf32>
    %118 = arith.truncf %117 : vector<8x8xf32> to vector<8x8xbf16>
    %119 = vector.extract_strided_slice %48 {offsets = [0, 56], sizes = [8, 8], strides = [1, 1]} : vector<8x64xf32> to vector<8x8xf32>
    %120 = arith.truncf %119 : vector<8x8xf32> to vector<8x8xbf16>
    %cst_41 = arith.constant dense<0.000000e+00> : vector<8x8xf32>
    %121 = tpu.matmul %116, %118, %cst_41 {dimension_numbers = #tpu.dot_dimension_numbers<[1], [1], [0], [0], [0, 0, 1, 0], [], []>} : vector<8x8xbf16>, vector<8x8xbf16>, vector<8x8xf32> -> vector<8x8xf32>
    %cst_42 = arith.constant 0.353553385 : f32
    %122 = vector.broadcast %cst_42 : f32 to vector<8x8xf32>
    %123 = arith.mulf %121, %122 : vector<8x8xf32>
    %124 = arith.addf %123, %12 : vector<8x8xf32>
    %cst_43 = arith.constant dense<0xFF800000> : vector<8xf32>
    %125 = vector.multi_reduction <maximumf>, %124, %cst_43 [1] : vector<8x8xf32> to vector<8xf32>
    %126 = vector.shape_cast %125 : vector<8xf32> to vector<8x1xf32>
    %127 = vector.broadcast %126 : vector<8x1xf32> to vector<8x8xf32>
    %128 = arith.subf %124, %127 : vector<8x8xf32>
    %129 = math.exp %128 : vector<8x8xf32>
    %cst_44 = arith.constant dense<0.000000e+00> : vector<8xf32>
    %130 = vector.multi_reduction <add>, %129, %cst_44 [1] : vector<8x8xf32> to vector<8xf32>
    %131 = vector.shape_cast %130 : vector<8xf32> to vector<8x1xf32>
    %132 = tpu.reciprocal %131 {approx = true} : vector<8x1xf32> -> vector<8x1xf32>
    %133 = vector.broadcast %132 : vector<8x1xf32> to vector<8x8xf32>
    %134 = arith.mulf %129, %133 : vector<8x8xf32>
    %135 = arith.truncf %134 : vector<8x8xf32> to vector<8x8xbf16>
    %cst_45 = arith.constant dense<0.000000e+00> : vector<8x8xf32>
    %136 = tpu.matmul %135, %120, %cst_45 {dimension_numbers = #tpu.dot_dimension_numbers<[1], [0], [0], [1], [0, 0, 1, 1], [], []>} : vector<8x8xbf16>, vector<8x8xbf16>, vector<8x8xf32> -> vector<8x8xf32>
    %137 = tpu.concatenate %70, %92, %114, %136 in 1 : vector<8x8xf32>, vector<8x8xf32>, vector<8x8xf32>, vector<8x8xf32> -> vector<8x32xf32>
    %138 = arith.truncf %137 : vector<8x32xf32> to vector<8x32xbf16>
    %c0_46 = arith.constant 0 : index
    %c0_47 = arith.constant 0 : index
    %139 = vector.load %arg9[%c0_46, %c0_47] : memref<32x128xbf16, #tpu.memory_space<vmem>>, vector<32x128xbf16>
    %cst_48 = arith.constant dense<0.000000e+00> : vector<8x128xf32>
    %140 = tpu.matmul %138, %139, %cst_48 {dimension_numbers = #tpu.dot_dimension_numbers<[1], [0], [0], [1], [0, 0, 1, 1], [], []>} : vector<8x32xbf16>, vector<32x128xbf16>, vector<8x128xf32> -> vector<8x128xf32>
    %c0_49 = arith.constant 0 : index
    %c0_50 = arith.constant 0 : index
    %141 = vector.load %arg10[%c0_49, %c0_50] : memref<1x128xf32, #tpu.memory_space<vmem>>, vector<1x128xf32>
    %142 = vector.broadcast %141 : vector<1x128xf32> to vector<8x128xf32>
    %143 = arith.addf %140, %142 : vector<8x128xf32>
    %144 = arith.addf %143, %36 : vector<8x128xf32>
    %cst_51 = arith.constant dense<0.000000e+00> : vector<8xf32>
    %145 = vector.multi_reduction <add>, %144, %cst_51 [1] : vector<8x128xf32> to vector<8xf32>
    %146 = vector.shape_cast %145 : vector<8xf32> to vector<8x1xf32>
    %cst_52 = arith.constant 3.125000e-02 : f32
    %147 = vector.broadcast %cst_52 : f32 to vector<8x1xf32>
    %148 = arith.mulf %146, %147 : vector<8x1xf32>
    %149 = vector.broadcast %148 : vector<8x1xf32> to vector<8x128xf32>
    %150 = arith.subf %144, %149 : vector<8x128xf32>
    %cst_53 = arith.constant 0.000000e+00 : f32
    %151 = vector.broadcast %cst_53 : f32 to vector<8x128xf32>
    %152 = arith.select %6, %150, %151 : vector<8x128xi1>, vector<8x128xf32>
    %153 = arith.mulf %152, %152 : vector<8x128xf32>
    %cst_54 = arith.constant dense<0.000000e+00> : vector<8xf32>
    %154 = vector.multi_reduction <add>, %153, %cst_54 [1] : vector<8x128xf32> to vector<8xf32>
    %155 = vector.shape_cast %154 : vector<8xf32> to vector<8x1xf32>
    %cst_55 = arith.constant 3.125000e-02 : f32
    %156 = vector.broadcast %cst_55 : f32 to vector<8x1xf32>
    %157 = arith.mulf %155, %156 : vector<8x1xf32>
    %cst_56 = arith.constant 9.99999974E-6 : f32
    %158 = vector.broadcast %cst_56 : f32 to vector<8x1xf32>
    %159 = arith.addf %157, %158 : vector<8x1xf32>
    %160 = math.rsqrt %159 : vector<8x1xf32>
    %161 = vector.broadcast %160 : vector<8x1xf32> to vector<8x128xf32>
    %162 = arith.mulf %152, %161 : vector<8x128xf32>
    %c0_57 = arith.constant 0 : index
    %c0_58 = arith.constant 0 : index
    %163 = vector.load %arg11[%c0_57, %c0_58] : memref<1x128xf32, #tpu.memory_space<vmem>>, vector<1x128xf32>
    %164 = vector.broadcast %163 : vector<1x128xf32> to vector<8x128xf32>
    %165 = arith.mulf %162, %164 : vector<8x128xf32>
    %c0_59 = arith.constant 0 : index
    %c0_60 = arith.constant 0 : index
    %166 = vector.load %arg12[%c0_59, %c0_60] : memref<1x128xf32, #tpu.memory_space<vmem>>, vector<1x128xf32>
    %167 = vector.broadcast %166 : vector<1x128xf32> to vector<8x128xf32>
    %168 = arith.addf %165, %167 : vector<8x128xf32>
    %cst_61 = arith.constant dense<0.000000e+00> : vector<8xf32>
    %169 = vector.multi_reduction <add>, %3, %cst_61 [1] : vector<8x128xf32> to vector<8xf32>
    %170 = vector.shape_cast %169 : vector<8xf32> to vector<8x1xf32>
    %cst_62 = arith.constant 3.125000e-02 : f32
    %171 = vector.broadcast %cst_62 : f32 to vector<8x1xf32>
    %172 = arith.mulf %170, %171 : vector<8x1xf32>
    %173 = vector.broadcast %172 : vector<8x1xf32> to vector<8x128xf32>
    %174 = arith.subf %3, %173 : vector<8x128xf32>
    %cst_63 = arith.constant 0.000000e+00 : f32
    %175 = vector.broadcast %cst_63 : f32 to vector<8x128xf32>
    %176 = arith.select %6, %174, %175 : vector<8x128xi1>, vector<8x128xf32>
    %177 = arith.mulf %176, %176 : vector<8x128xf32>
    %cst_64 = arith.constant dense<0.000000e+00> : vector<8xf32>
    %178 = vector.multi_reduction <add>, %177, %cst_64 [1] : vector<8x128xf32> to vector<8xf32>
    %179 = vector.shape_cast %178 : vector<8xf32> to vector<8x1xf32>
    %cst_65 = arith.constant 3.125000e-02 : f32
    %180 = vector.broadcast %cst_65 : f32 to vector<8x1xf32>
    %181 = arith.mulf %179, %180 : vector<8x1xf32>
    %cst_66 = arith.constant 9.99999974E-6 : f32
    %182 = vector.broadcast %cst_66 : f32 to vector<8x1xf32>
    %183 = arith.addf %181, %182 : vector<8x1xf32>
    %184 = math.rsqrt %183 : vector<8x1xf32>
    %185 = vector.broadcast %184 : vector<8x1xf32> to vector<8x128xf32>
    %186 = arith.mulf %176, %185 : vector<8x128xf32>
    %c0_67 = arith.constant 0 : index
    %c0_68 = arith.constant 0 : index
    %187 = vector.load %arg11[%c0_67, %c0_68] : memref<1x128xf32, #tpu.memory_space<vmem>>, vector<1x128xf32>
    %188 = vector.broadcast %187 : vector<1x128xf32> to vector<8x128xf32>
    %189 = arith.mulf %186, %188 : vector<8x128xf32>
    %c0_69 = arith.constant 0 : index
    %c0_70 = arith.constant 0 : index
    %190 = vector.load %arg12[%c0_69, %c0_70] : memref<1x128xf32, #tpu.memory_space<vmem>>, vector<1x128xf32>
    %191 = vector.broadcast %190 : vector<1x128xf32> to vector<8x128xf32>
    %192 = arith.addf %189, %191 : vector<8x128xf32>
    %193 = arith.truncf %168 : vector<8x128xf32> to vector<8x128xbf16>
    %194 = arith.truncf %192 : vector<8x128xf32> to vector<8x128xbf16>
    %c0_71 = arith.constant 0 : index
    %c0_72 = arith.constant 0 : index
    %195 = vector.load %arg13[%c0_71, %c0_72] : memref<128x32xbf16, #tpu.memory_space<vmem>>, vector<128x32xbf16>
    %cst_73 = arith.constant dense<0.000000e+00> : vector<8x32xf32>
    %196 = tpu.matmul %193, %195, %cst_73 {dimension_numbers = #tpu.dot_dimension_numbers<[1], [0], [0], [1], [0, 0, 1, 1], [], []>} : vector<8x128xbf16>, vector<128x32xbf16>, vector<8x32xf32> -> vector<8x32xf32>
    %c0_74 = arith.constant 0 : index
    %c0_75 = arith.constant 0 : index
    %197 = vector.load %arg14[%c0_74, %c0_75] : memref<1x32xf32, #tpu.memory_space<vmem>>, vector<1x32xf32>
    %198 = vector.broadcast %197 : vector<1x32xf32> to vector<8x32xf32>
    %199 = arith.addf %196, %198 : vector<8x32xf32>
    %c0_76 = arith.constant 0 : index
    %c0_77 = arith.constant 0 : index
    %200 = vector.load %arg15[%c0_76, %c0_77] : memref<128x64xbf16, #tpu.memory_space<vmem>>, vector<128x64xbf16>
    %cst_78 = arith.constant dense<0.000000e+00> : vector<8x64xf32>
    %201 = tpu.matmul %194, %200, %cst_78 {dimension_numbers = #tpu.dot_dimension_numbers<[1], [0], [0], [1], [0, 0, 1, 1], [], []>} : vector<8x128xbf16>, vector<128x64xbf16>, vector<8x64xf32> -> vector<8x64xf32>
    %c0_79 = arith.constant 0 : index
    %c0_80 = arith.constant 0 : index
    %202 = vector.load %arg16[%c0_79, %c0_80] : memref<1x64xf32, #tpu.memory_space<vmem>>, vector<1x64xf32>
    %203 = vector.broadcast %202 : vector<1x64xf32> to vector<8x64xf32>
    %204 = arith.addf %201, %203 : vector<8x64xf32>
    %205 = vector.extract_strided_slice %199 {offsets = [0, 0], sizes = [8, 8], strides = [1, 1]} : vector<8x32xf32> to vector<8x8xf32>
    %206 = arith.truncf %205 : vector<8x8xf32> to vector<8x8xbf16>
    %207 = vector.extract_strided_slice %204 {offsets = [0, 0], sizes = [8, 8], strides = [1, 1]} : vector<8x64xf32> to vector<8x8xf32>
    %208 = arith.truncf %207 : vector<8x8xf32> to vector<8x8xbf16>
    %209 = vector.extract_strided_slice %204 {offsets = [0, 32], sizes = [8, 8], strides = [1, 1]} : vector<8x64xf32> to vector<8x8xf32>
    %210 = arith.truncf %209 : vector<8x8xf32> to vector<8x8xbf16>
    %cst_81 = arith.constant dense<0.000000e+00> : vector<8x8xf32>
    %211 = tpu.matmul %206, %208, %cst_81 {dimension_numbers = #tpu.dot_dimension_numbers<[1], [1], [0], [0], [0, 0, 1, 0], [], []>} : vector<8x8xbf16>, vector<8x8xbf16>, vector<8x8xf32> -> vector<8x8xf32>
    %cst_82 = arith.constant 0.353553385 : f32
    %212 = vector.broadcast %cst_82 : f32 to vector<8x8xf32>
    %213 = arith.mulf %211, %212 : vector<8x8xf32>
    %214 = arith.addf %213, %12 : vector<8x8xf32>
    %cst_83 = arith.constant dense<0xFF800000> : vector<8xf32>
    %215 = vector.multi_reduction <maximumf>, %214, %cst_83 [1] : vector<8x8xf32> to vector<8xf32>
    %216 = vector.shape_cast %215 : vector<8xf32> to vector<8x1xf32>
    %217 = vector.broadcast %216 : vector<8x1xf32> to vector<8x8xf32>
    %218 = arith.subf %214, %217 : vector<8x8xf32>
    %219 = math.exp %218 : vector<8x8xf32>
    %cst_84 = arith.constant dense<0.000000e+00> : vector<8xf32>
    %220 = vector.multi_reduction <add>, %219, %cst_84 [1] : vector<8x8xf32> to vector<8xf32>
    %221 = vector.shape_cast %220 : vector<8xf32> to vector<8x1xf32>
    %222 = tpu.reciprocal %221 {approx = true} : vector<8x1xf32> -> vector<8x1xf32>
    %223 = vector.broadcast %222 : vector<8x1xf32> to vector<8x8xf32>
    %224 = arith.mulf %219, %223 : vector<8x8xf32>
    %225 = arith.truncf %224 : vector<8x8xf32> to vector<8x8xbf16>
    %cst_85 = arith.constant dense<0.000000e+00> : vector<8x8xf32>
    %226 = tpu.matmul %225, %210, %cst_85 {dimension_numbers = #tpu.dot_dimension_numbers<[1], [0], [0], [1], [0, 0, 1, 1], [], []>} : vector<8x8xbf16>, vector<8x8xbf16>, vector<8x8xf32> -> vector<8x8xf32>
    %227 = vector.extract_strided_slice %199 {offsets = [0, 8], sizes = [8, 8], strides = [1, 1]} : vector<8x32xf32> to vector<8x8xf32>
    %228 = arith.truncf %227 : vector<8x8xf32> to vector<8x8xbf16>
    %229 = vector.extract_strided_slice %204 {offsets = [0, 8], sizes = [8, 8], strides = [1, 1]} : vector<8x64xf32> to vector<8x8xf32>
    %230 = arith.truncf %229 : vector<8x8xf32> to vector<8x8xbf16>
    %231 = vector.extract_strided_slice %204 {offsets = [0, 40], sizes = [8, 8], strides = [1, 1]} : vector<8x64xf32> to vector<8x8xf32>
    %232 = arith.truncf %231 : vector<8x8xf32> to vector<8x8xbf16>
    %cst_86 = arith.constant dense<0.000000e+00> : vector<8x8xf32>
    %233 = tpu.matmul %228, %230, %cst_86 {dimension_numbers = #tpu.dot_dimension_numbers<[1], [1], [0], [0], [0, 0, 1, 0], [], []>} : vector<8x8xbf16>, vector<8x8xbf16>, vector<8x8xf32> -> vector<8x8xf32>
    %cst_87 = arith.constant 0.353553385 : f32
    %234 = vector.broadcast %cst_87 : f32 to vector<8x8xf32>
    %235 = arith.mulf %233, %234 : vector<8x8xf32>
    %236 = arith.addf %235, %12 : vector<8x8xf32>
    %cst_88 = arith.constant dense<0xFF800000> : vector<8xf32>
    %237 = vector.multi_reduction <maximumf>, %236, %cst_88 [1] : vector<8x8xf32> to vector<8xf32>
    %238 = vector.shape_cast %237 : vector<8xf32> to vector<8x1xf32>
    %239 = vector.broadcast %238 : vector<8x1xf32> to vector<8x8xf32>
    %240 = arith.subf %236, %239 : vector<8x8xf32>
    %241 = math.exp %240 : vector<8x8xf32>
    %cst_89 = arith.constant dense<0.000000e+00> : vector<8xf32>
    %242 = vector.multi_reduction <add>, %241, %cst_89 [1] : vector<8x8xf32> to vector<8xf32>
    %243 = vector.shape_cast %242 : vector<8xf32> to vector<8x1xf32>
    %244 = tpu.reciprocal %243 {approx = true} : vector<8x1xf32> -> vector<8x1xf32>
    %245 = vector.broadcast %244 : vector<8x1xf32> to vector<8x8xf32>
    %246 = arith.mulf %241, %245 : vector<8x8xf32>
    %247 = arith.truncf %246 : vector<8x8xf32> to vector<8x8xbf16>
    %cst_90 = arith.constant dense<0.000000e+00> : vector<8x8xf32>
    %248 = tpu.matmul %247, %232, %cst_90 {dimension_numbers = #tpu.dot_dimension_numbers<[1], [0], [0], [1], [0, 0, 1, 1], [], []>} : vector<8x8xbf16>, vector<8x8xbf16>, vector<8x8xf32> -> vector<8x8xf32>
    %249 = vector.extract_strided_slice %199 {offsets = [0, 16], sizes = [8, 8], strides = [1, 1]} : vector<8x32xf32> to vector<8x8xf32>
    %250 = arith.truncf %249 : vector<8x8xf32> to vector<8x8xbf16>
    %251 = vector.extract_strided_slice %204 {offsets = [0, 16], sizes = [8, 8], strides = [1, 1]} : vector<8x64xf32> to vector<8x8xf32>
    %252 = arith.truncf %251 : vector<8x8xf32> to vector<8x8xbf16>
    %253 = vector.extract_strided_slice %204 {offsets = [0, 48], sizes = [8, 8], strides = [1, 1]} : vector<8x64xf32> to vector<8x8xf32>
    %254 = arith.truncf %253 : vector<8x8xf32> to vector<8x8xbf16>
    %cst_91 = arith.constant dense<0.000000e+00> : vector<8x8xf32>
    %255 = tpu.matmul %250, %252, %cst_91 {dimension_numbers = #tpu.dot_dimension_numbers<[1], [1], [0], [0], [0, 0, 1, 0], [], []>} : vector<8x8xbf16>, vector<8x8xbf16>, vector<8x8xf32> -> vector<8x8xf32>
    %cst_92 = arith.constant 0.353553385 : f32
    %256 = vector.broadcast %cst_92 : f32 to vector<8x8xf32>
    %257 = arith.mulf %255, %256 : vector<8x8xf32>
    %258 = arith.addf %257, %12 : vector<8x8xf32>
    %cst_93 = arith.constant dense<0xFF800000> : vector<8xf32>
    %259 = vector.multi_reduction <maximumf>, %258, %cst_93 [1] : vector<8x8xf32> to vector<8xf32>
    %260 = vector.shape_cast %259 : vector<8xf32> to vector<8x1xf32>
    %261 = vector.broadcast %260 : vector<8x1xf32> to vector<8x8xf32>
    %262 = arith.subf %258, %261 : vector<8x8xf32>
    %263 = math.exp %262 : vector<8x8xf32>
    %cst_94 = arith.constant dense<0.000000e+00> : vector<8xf32>
    %264 = vector.multi_reduction <add>, %263, %cst_94 [1] : vector<8x8xf32> to vector<8xf32>
    %265 = vector.shape_cast %264 : vector<8xf32> to vector<8x1xf32>
    %266 = tpu.reciprocal %265 {approx = true} : vector<8x1xf32> -> vector<8x1xf32>
    %267 = vector.broadcast %266 : vector<8x1xf32> to vector<8x8xf32>
    %268 = arith.mulf %263, %267 : vector<8x8xf32>
    %269 = arith.truncf %268 : vector<8x8xf32> to vector<8x8xbf16>
    %cst_95 = arith.constant dense<0.000000e+00> : vector<8x8xf32>
    %270 = tpu.matmul %269, %254, %cst_95 {dimension_numbers = #tpu.dot_dimension_numbers<[1], [0], [0], [1], [0, 0, 1, 1], [], []>} : vector<8x8xbf16>, vector<8x8xbf16>, vector<8x8xf32> -> vector<8x8xf32>
    %271 = vector.extract_strided_slice %199 {offsets = [0, 24], sizes = [8, 8], strides = [1, 1]} : vector<8x32xf32> to vector<8x8xf32>
    %272 = arith.truncf %271 : vector<8x8xf32> to vector<8x8xbf16>
    %273 = vector.extract_strided_slice %204 {offsets = [0, 24], sizes = [8, 8], strides = [1, 1]} : vector<8x64xf32> to vector<8x8xf32>
    %274 = arith.truncf %273 : vector<8x8xf32> to vector<8x8xbf16>
    %275 = vector.extract_strided_slice %204 {offsets = [0, 56], sizes = [8, 8], strides = [1, 1]} : vector<8x64xf32> to vector<8x8xf32>
    %276 = arith.truncf %275 : vector<8x8xf32> to vector<8x8xbf16>
    %cst_96 = arith.constant dense<0.000000e+00> : vector<8x8xf32>
    %277 = tpu.matmul %272, %274, %cst_96 {dimension_numbers = #tpu.dot_dimension_numbers<[1], [1], [0], [0], [0, 0, 1, 0], [], []>} : vector<8x8xbf16>, vector<8x8xbf16>, vector<8x8xf32> -> vector<8x8xf32>
    %cst_97 = arith.constant 0.353553385 : f32
    %278 = vector.broadcast %cst_97 : f32 to vector<8x8xf32>
    %279 = arith.mulf %277, %278 : vector<8x8xf32>
    %280 = arith.addf %279, %12 : vector<8x8xf32>
    %cst_98 = arith.constant dense<0xFF800000> : vector<8xf32>
    %281 = vector.multi_reduction <maximumf>, %280, %cst_98 [1] : vector<8x8xf32> to vector<8xf32>
    %282 = vector.shape_cast %281 : vector<8xf32> to vector<8x1xf32>
    %283 = vector.broadcast %282 : vector<8x1xf32> to vector<8x8xf32>
    %284 = arith.subf %280, %283 : vector<8x8xf32>
    %285 = math.exp %284 : vector<8x8xf32>
    %cst_99 = arith.constant dense<0.000000e+00> : vector<8xf32>
    %286 = vector.multi_reduction <add>, %285, %cst_99 [1] : vector<8x8xf32> to vector<8xf32>
    %287 = vector.shape_cast %286 : vector<8xf32> to vector<8x1xf32>
    %288 = tpu.reciprocal %287 {approx = true} : vector<8x1xf32> -> vector<8x1xf32>
    %289 = vector.broadcast %288 : vector<8x1xf32> to vector<8x8xf32>
    %290 = arith.mulf %285, %289 : vector<8x8xf32>
    %291 = arith.truncf %290 : vector<8x8xf32> to vector<8x8xbf16>
    %cst_100 = arith.constant dense<0.000000e+00> : vector<8x8xf32>
    %292 = tpu.matmul %291, %276, %cst_100 {dimension_numbers = #tpu.dot_dimension_numbers<[1], [0], [0], [1], [0, 0, 1, 1], [], []>} : vector<8x8xbf16>, vector<8x8xbf16>, vector<8x8xf32> -> vector<8x8xf32>
    %293 = tpu.concatenate %226, %248, %270, %292 in 1 : vector<8x8xf32>, vector<8x8xf32>, vector<8x8xf32>, vector<8x8xf32> -> vector<8x32xf32>
    %294 = arith.truncf %293 : vector<8x32xf32> to vector<8x32xbf16>
    %c0_101 = arith.constant 0 : index
    %c0_102 = arith.constant 0 : index
    %295 = vector.load %arg17[%c0_101, %c0_102] : memref<32x128xbf16, #tpu.memory_space<vmem>>, vector<32x128xbf16>
    %cst_103 = arith.constant dense<0.000000e+00> : vector<8x128xf32>
    %296 = tpu.matmul %294, %295, %cst_103 {dimension_numbers = #tpu.dot_dimension_numbers<[1], [0], [0], [1], [0, 0, 1, 1], [], []>} : vector<8x32xbf16>, vector<32x128xbf16>, vector<8x128xf32> -> vector<8x128xf32>
    %c0_104 = arith.constant 0 : index
    %c0_105 = arith.constant 0 : index
    %297 = vector.load %arg18[%c0_104, %c0_105] : memref<1x128xf32, #tpu.memory_space<vmem>>, vector<1x128xf32>
    %298 = vector.broadcast %297 : vector<1x128xf32> to vector<8x128xf32>
    %299 = arith.addf %296, %298 : vector<8x128xf32>
    %300 = arith.addf %299, %168 : vector<8x128xf32>
    %cst_106 = arith.constant dense<0.000000e+00> : vector<8xf32>
    %301 = vector.multi_reduction <add>, %300, %cst_106 [1] : vector<8x128xf32> to vector<8xf32>
    %302 = vector.shape_cast %301 : vector<8xf32> to vector<8x1xf32>
    %cst_107 = arith.constant 3.125000e-02 : f32
    %303 = vector.broadcast %cst_107 : f32 to vector<8x1xf32>
    %304 = arith.mulf %302, %303 : vector<8x1xf32>
    %305 = vector.broadcast %304 : vector<8x1xf32> to vector<8x128xf32>
    %306 = arith.subf %300, %305 : vector<8x128xf32>
    %cst_108 = arith.constant 0.000000e+00 : f32
    %307 = vector.broadcast %cst_108 : f32 to vector<8x128xf32>
    %308 = arith.select %6, %306, %307 : vector<8x128xi1>, vector<8x128xf32>
    %309 = arith.mulf %308, %308 : vector<8x128xf32>
    %cst_109 = arith.constant dense<0.000000e+00> : vector<8xf32>
    %310 = vector.multi_reduction <add>, %309, %cst_109 [1] : vector<8x128xf32> to vector<8xf32>
    %311 = vector.shape_cast %310 : vector<8xf32> to vector<8x1xf32>
    %cst_110 = arith.constant 3.125000e-02 : f32
    %312 = vector.broadcast %cst_110 : f32 to vector<8x1xf32>
    %313 = arith.mulf %311, %312 : vector<8x1xf32>
    %cst_111 = arith.constant 9.99999974E-6 : f32
    %314 = vector.broadcast %cst_111 : f32 to vector<8x1xf32>
    %315 = arith.addf %313, %314 : vector<8x1xf32>
    %316 = math.rsqrt %315 : vector<8x1xf32>
    %317 = vector.broadcast %316 : vector<8x1xf32> to vector<8x128xf32>
    %318 = arith.mulf %308, %317 : vector<8x128xf32>
    %c0_112 = arith.constant 0 : index
    %c0_113 = arith.constant 0 : index
    %319 = vector.load %arg19[%c0_112, %c0_113] : memref<1x128xf32, #tpu.memory_space<vmem>>, vector<1x128xf32>
    %320 = vector.broadcast %319 : vector<1x128xf32> to vector<8x128xf32>
    %321 = arith.mulf %318, %320 : vector<8x128xf32>
    %c0_114 = arith.constant 0 : index
    %c0_115 = arith.constant 0 : index
    %322 = vector.load %arg20[%c0_114, %c0_115] : memref<1x128xf32, #tpu.memory_space<vmem>>, vector<1x128xf32>
    %323 = vector.broadcast %322 : vector<1x128xf32> to vector<8x128xf32>
    %324 = arith.addf %321, %323 : vector<8x128xf32>
    %325 = arith.truncf %324 : vector<8x128xf32> to vector<8x128xbf16>
    %c0_116 = arith.constant 0 : index
    %c0_117 = arith.constant 0 : index
    %326 = vector.load %arg21[%c0_116, %c0_117] : memref<128x128xbf16, #tpu.memory_space<vmem>>, vector<128x128xbf16>
    %cst_118 = arith.constant dense<0.000000e+00> : vector<8x128xf32>
    %327 = tpu.matmul %325, %326, %cst_118 {dimension_numbers = #tpu.dot_dimension_numbers<[1], [0], [0], [1], [0, 0, 1, 1], [], []>} : vector<8x128xbf16>, vector<128x128xbf16>, vector<8x128xf32> -> vector<8x128xf32>
    %c0_119 = arith.constant 0 : index
    %c0_120 = arith.constant 0 : index
    %328 = vector.load %arg22[%c0_119, %c0_120] : memref<1x128xf32, #tpu.memory_space<vmem>>, vector<1x128xf32>
    %329 = vector.broadcast %328 : vector<1x128xf32> to vector<8x128xf32>
    %330 = arith.addf %327, %329 : vector<8x128xf32>
    %cst_121 = arith.constant 0.000000e+00 : f32
    %331 = vector.broadcast %cst_121 : f32 to vector<8x128xf32>
    %332 = arith.maximumf %330, %331 : vector<8x128xf32>
    %333 = arith.truncf %332 : vector<8x128xf32> to vector<8x128xbf16>
    %c0_122 = arith.constant 0 : index
    %c0_123 = arith.constant 0 : index
    %334 = vector.load %arg23[%c0_122, %c0_123] : memref<128x128xbf16, #tpu.memory_space<vmem>>, vector<128x128xbf16>
    %cst_124 = arith.constant dense<0.000000e+00> : vector<8x128xf32>
    %335 = tpu.matmul %333, %334, %cst_124 {dimension_numbers = #tpu.dot_dimension_numbers<[1], [0], [0], [1], [0, 0, 1, 1], [], []>} : vector<8x128xbf16>, vector<128x128xbf16>, vector<8x128xf32> -> vector<8x128xf32>
    %c0_125 = arith.constant 0 : index
    %c0_126 = arith.constant 0 : index
    %336 = vector.load %arg24[%c0_125, %c0_126] : memref<1x128xf32, #tpu.memory_space<vmem>>, vector<1x128xf32>
    %337 = vector.broadcast %336 : vector<1x128xf32> to vector<8x128xf32>
    %338 = arith.addf %335, %337 : vector<8x128xf32>
    %339 = arith.addf %338, %324 : vector<8x128xf32>
    %c0_127 = arith.constant 0 : index
    %c0_128 = arith.constant 0 : index
    %c0_129 = arith.constant 0 : index
    %340 = vector.load %arg25[%c0_127, %c0_128, %c0_129] : memref<1x8x128xf32, #tpu.memory_space<vmem>>, vector<1x8x128xf32>
    %341 = vector.shape_cast %340 : vector<1x8x128xf32> to vector<8x128xf32>
    %342 = vector.shape_cast %339 : vector<8x128xf32> to vector<1x8x128xf32>
    tpu.vector_store %arg25[%c0_127, %c0_128, %c0_129], %342 {strides = array<i32>} : memref<1x8x128xf32, #tpu.memory_space<vmem>>, vector<1x8x128xf32>,
    return
  }
  func.func @transform_0(%arg0: i32) -> (i32, i32, i32) {
    %c0_i32 = arith.constant 0 : i32
    %c0_i32_0 = arith.constant 0 : i32
    %c0_i32_1 = arith.constant 0 : i32
    return %arg0, %c0_i32, %c0_i32_0 : i32, i32, i32
  }
  func.func @transform_1(%arg0: i32) -> (i32, i32, i32) {
    %c0_i32 = arith.constant 0 : i32
    %c0_i32_0 = arith.constant 0 : i32
    %c0_i32_1 = arith.constant 0 : i32
    return %arg0, %c0_i32, %c0_i32_0 : i32, i32, i32
  }
  func.func @transform_2(%arg0: i32) -> (i32, i32) {
    %c0_i32 = arith.constant 0 : i32
    %c0_i32_0 = arith.constant 0 : i32
    %c0_i32_1 = arith.constant 0 : i32
    return %c0_i32, %c0_i32_0 : i32, i32
  }
  func.func @transform_3(%arg0: i32) -> (i32, i32) {
    %c0_i32 = arith.constant 0 : i32
    %c0_i32_0 = arith.constant 0 : i32
    %c0_i32_1 = arith.constant 0 : i32
    return %c0_i32, %c0_i32_0 : i32, i32
  }
  func.func @transform_4(%arg0: i32) -> (i32, i32) {
    %c0_i32 = arith.constant 0 : i32
    %c0_i32_0 = arith.constant 0 : i32
    %c0_i32_1 = arith.constant 0 : i32
    return %c0_i32, %c0_i32_0 : i32, i32
  }
  func.func @transform_5(%arg0: i32) -> (i32, i32) {
    %c0_i32 = arith.constant 0 : i32
    %c0_i32_0 = arith.constant 0 : i32
    %c0_i32_1 = arith.constant 0 : i32
    return %c0_i32, %c0_i32_0 : i32, i32
  }
  func.func @transform_6(%arg0: i32) -> (i32, i32) {
    %c0_i32 = arith.constant 0 : i32
    %c0_i32_0 = arith.constant 0 : i32
    %c0_i32_1 = arith.constant 0 : i32
    return %c0_i32, %c0_i32_0 : i32, i32
  }
  func.func @transform_7(%arg0: i32) -> (i32, i32) {
    %c0_i32 = arith.constant 0 : i32
    %c0_i32_0 = arith.constant 0 : i32
    %c0_i32_1 = arith.constant 0 : i32
    return %c0_i32, %c0_i32_0 : i32, i32
  }
  func.func @transform_8(%arg0: i32) -> (i32, i32) {
    %c0_i32 = arith.constant 0 : i32
    %c0_i32_0 = arith.constant 0 : i32
    %c0_i32_1 = arith.constant 0 : i32
    return %c0_i32, %c0_i32_0 : i32, i32
  }
  func.func @transform_9(%arg0: i32) -> (i32, i32) {
    %c0_i32 = arith.constant 0 : i32
    %c0_i32_0 = arith.constant 0 : i32
    %c0_i32_1 = arith.constant 0 : i32
    return %c0_i32, %c0_i32_0 : i32, i32
  }
  func.func @transform_10(%arg0: i32) -> (i32, i32) {
    %c0_i32 = arith.constant 0 : i32
    %c0_i32_0 = arith.constant 0 : i32
    %c0_i32_1 = arith.constant 0 : i32
    return %c0_i32, %c0_i32_0 : i32, i32
  }
  func.func @transform_11(%arg0: i32) -> (i32, i32) {
    %c0_i32 = arith.constant 0 : i32
    %c0_i32_0 = arith.constant 0 : i32
    %c0_i32_1 = arith.constant 0 : i32
    return %c0_i32, %c0_i32_0 : i32, i32
  }
  func.func @transform_12(%arg0: i32) -> (i32, i32) {
    %c0_i32 = arith.constant 0 : i32
    %c0_i32_0 = arith.constant 0 : i32
    %c0_i32_1 = arith.constant 0 : i32
    return %c0_i32, %c0_i32_0 : i32, i32
  }
  func.func @transform_13(%arg0: i32) -> (i32, i32) {
    %c0_i32 = arith.constant 0 : i32
    %c0_i32_0 = arith.constant 0 : i32
    %c0_i32_1 = arith.constant 0 : i32
    return %c0_i32, %c0_i32_0 : i32, i32
  }
  func.func @transform_14(%arg0: i32) -> (i32, i32) {
    %c0_i32 = arith.constant 0 : i32
    %c0_i32_0 = arith.constant 0 : i32
    %c0_i32_1 = arith.constant 0 : i32
    return %c0_i32, %c0_i32_0 : i32, i32
  }
  func.func @transform_15(%arg0: i32) -> (i32, i32) {
    %c0_i32 = arith.constant 0 : i32
    %c0_i32_0 = arith.constant 0 : i32
    %c0_i32_1 = arith.constant 0 : i32
    return %c0_i32, %c0_i32_0 : i32, i32
  }
  func.func @transform_16(%arg0: i32) -> (i32, i32) {
    %c0_i32 = arith.constant 0 : i32
    %c0_i32_0 = arith.constant 0 : i32
    %c0_i32_1 = arith.constant 0 : i32
    return %c0_i32, %c0_i32_0 : i32, i32
  }
  func.func @transform_17(%arg0: i32) -> (i32, i32) {
    %c0_i32 = arith.constant 0 : i32
    %c0_i32_0 = arith.constant 0 : i32
    %c0_i32_1 = arith.constant 0 : i32
    return %c0_i32, %c0_i32_0 : i32, i32
  }
  func.func @transform_18(%arg0: i32) -> (i32, i32) {
    %c0_i32 = arith.constant 0 : i32
    %c0_i32_0 = arith.constant 0 : i32
    %c0_i32_1 = arith.constant 0 : i32
    return %c0_i32, %c0_i32_0 : i32, i32
  }
  func.func @transform_19(%arg0: i32) -> (i32, i32) {
    %c0_i32 = arith.constant 0 : i32
    %c0_i32_0 = arith.constant 0 : i32
    %c0_i32_1 = arith.constant 0 : i32
    return %c0_i32, %c0_i32_0 : i32, i32
  }
  func.func @transform_20(%arg0: i32) -> (i32, i32) {
    %c0_i32 = arith.constant 0 : i32
    %c0_i32_0 = arith.constant 0 : i32
    %c0_i32_1 = arith.constant 0 : i32
    return %c0_i32, %c0_i32_0 : i32, i32
  }
  func.func @transform_21(%arg0: i32) -> (i32, i32) {
    %c0_i32 = arith.constant 0 : i32
    %c0_i32_0 = arith.constant 0 : i32
    %c0_i32_1 = arith.constant 0 : i32
    return %c0_i32, %c0_i32_0 : i32, i32
  }
  func.func @transform_22(%arg0: i32) -> (i32, i32) {
    %c0_i32 = arith.constant 0 : i32
    %c0_i32_0 = arith.constant 0 : i32
    %c0_i32_1 = arith.constant 0 : i32
    return %c0_i32, %c0_i32_0 : i32, i32
  }
  func.func @transform_23(%arg0: i32) -> (i32, i32) {
    %c0_i32 = arith.constant 0 : i32
    %c0_i32_0 = arith.constant 0 : i32
    %c0_i32_1 = arith.constant 0 : i32
    return %c0_i32, %c0_i32_0 : i32, i32
  }
  func.func @transform_24(%arg0: i32) -> (i32, i32, i32) {
    %c0_i32 = arith.constant 0 : i32
    %c0_i32_0 = arith.constant 0 : i32
    %c0_i32_1 = arith.constant 0 : i32
    return %arg0, %c0_i32, %c0_i32_0 : i32, i32, i32
  }
}

</mosaic_0001>

<bundles_post_ra>
// kernel: decoder_block_forward.1
= control target key start
LH: loop header
LB: loop body
LE: loop exit
PB: predicated region body
PF: predicated region fallthrough
CT: control target
= control target key end

     0   :  { %s4013_s0 = inlined_call_operand.vmem [shape: f32[2,8,128], index: 0, kind: input, shape index: {}]   ;;  %s4014_s1 = inlined_call_operand.vmem [shape: f32[2,8,128], index: 1, kind: input, shape index: {}]   ;;  %s4015_s2 = inlined_call_operand.vmem [shape: f32[1,128], index: 2, kind: input, shape index: {}]   ;;  %s4016_s3 = inlined_call_operand.vmem [shape: f32[1,128], index: 3, kind: input, shape index: {}]   ;;  %s4017_s4 = inlined_call_operand.vmem [shape: bf16[128,32], index: 4, kind: input, shape index: {}]   ;;  %s4018_s5 = inlined_call_operand.vmem [shape: f32[1,32], index: 5, kind: input, shape index: {}]   ;;  %s4019_s6 = inlined_call_operand.vmem [shape: bf16[128,64], index: 6, kind: input, shape index: {}]   ;;  %s4020_s7 = inlined_call_operand.vmem [shape: f32[1,64], index: 7, kind: input, shape index: {}]   ;;  %s4021_s8 = inlined_call_operand.vmem [shape: bf16[32,128], index: 8, kind: input, shape index: {}]   ;;  %s4022_s9 = inlined_call_operand.vmem [shape: f32[1,128], index: 9, kind: input, shape index: {}]   ;;  %s4023_s10 = inlined_call_operand.vmem [shape: f32[1,128], index: 10, kind: input, shape index: {}]   ;;  %s4024_s11 = inlined_call_operand.vmem [shape: f32[1,128], index: 11, kind: input, shape index: {}]   ;;  %s4025_s12 = inlined_call_operand.vmem [shape: bf16[128,32], index: 12, kind: input, shape index: {}]   ;;  %s4026_s13 = inlined_call_operand.vmem [shape: f32[1,32], index: 13, kind: input, shape index: {}]   ;;  %s4027_s14 = inlined_call_operand.vmem [shape: bf16[128,64], index: 14, kind: input, shape index: {}]   ;;  %s4028_s15 = inlined_call_operand.vmem [shape: f32[1,64], index: 15, kind: input, shape index: {}]   ;;  %s4029_s16 = inlined_call_operand.vmem [shape: bf16[32,128], index: 16, kind: input, shape index: {}]   ;;  %s4030_s17 = inlined_call_operand.vmem [shape: f32[1,128], index: 17, kind: input, shape index: {}]   ;;  %s4031_s18 = inlined_call_operand.vmem [shape: f32[1,128], index: 18, kind: input, shape index: {}]   ;;  %s4032_s19 = inlined_call_operand.vmem [shape: f32[1,128], index: 19, kind: input, shape index: {}]   ;;  %s4033_s20 = inlined_call_operand.vmem [shape: bf16[128,128], index: 20, kind: input, shape index: {}]   ;;  %s4034_s21 = inlined_call_operand.vmem [shape: f32[1,128], index: 21, kind: input, shape index: {}]   ;;  %s4035_s22 = inlined_call_operand.vmem [shape: bf16[128,128], index: 22, kind: input, shape index: {}]   ;;  %s4036_s23 = inlined_call_operand.vmem [shape: f32[1,128], index: 23, kind: input, shape index: {}]   ;;  %s4037_s24 = inlined_call_operand.hbm [shape: f32[2,8,128], index: 24, kind: output, shape index: {}]  }
   0x1   :  { %4061 = sst [smem:[#allocation10_spill]] %s4013_s0 }
   0x2   :  { %4062 = sst [smem:[#allocation11_spill]] %s4014_s1 }
   0x3   :  { %4063 = sst [smem:[#allocation12_spill]] %s4015_s2 }
   0x4   :  { %4064 = sst [smem:[#allocation13_spill]] %s4016_s3 }
   0x5   :  { %4065 = sst [smem:[#allocation14_spill]] %s4017_s4 }
   0x6   :  { %4066 = sst [smem:[#allocation15_spill]] %s4018_s5 }
   0x7   :  { %4067 = sst [smem:[#allocation16_spill]] %s4019_s6 }
   0x8   :  { %4068 = sst [smem:[#allocation17_spill]] %s4020_s7 }
   0x9   :  { %4069 = sst [smem:[#allocation18_spill]] %s4021_s8 }
   0xa   :  { %4070 = sst [smem:[#allocation19_spill]] %s4022_s9 }
   0xb   :  { %4071 = sst [smem:[#allocation20_spill]] %s4023_s10 }
   0xc   :  { %29 = vsyncpa [#allocation3], 0 }
   0xd   :  { %31 = vsyncpa [#allocation3 + $0x1], 0  ;;  %s3448_s5 = smov 0   ;;  %s3450_s26 = smov 0  }
   0xe   :  { %s3452_s27 = smov 0   ;;  %s3454_s28 = smov 0  }
   0xf LB: > { %4072 = sst [smem:[#allocation5_spill]] %s3296_s5  ;;  %s3469_s6 = sadd.s32 4294967295, %s3308_s28   ;;  %s3308_s28 = sphi %s3454_s28, %s4103_s28   ;;  %s3304_s27 = sphi %s3452_s27, %s4105_s27   ;;  %s3300_s26 = sphi %s3450_s26, %s4107_s26   ;;  %s3296_s5 = sphi %s3448_s5, %s4106_s5  }
  0x10   : > { %4073 = sst [smem:[#allocation6_spill]] %s3304_s27  ;;  %s2684_s2 = sadd.s32 4294967294, %s3308_s28  }
  0x11   : > { %s3473_s29 = sadd.s32 1, %s3308_s28   ;;  %s558_s0 = sadd.s32 1, %s3304_s27 }
  0x12   : > { %4074 = sst [smem:[#allocation7_spill]] %s3473_s29  ;;  %s555_s7 = ssub.s32 %s3308_s28, %s3473_s29 }
  0x13   : > { %p568_p0 = scmp.ne.s32.totalorder %s3304_s27, %s3300_s26  ;;  %p556_p1 = scmp.eq.s32.totalorder %s555_s7, 0 }
  0x14   : > { %p569_p2 = scmp.eq.s32.totalorder %s3469_s6, 1  ;;  %p574_p3 = scmp.ne.s32.totalorder %s3300_s26, %s3296_s5 }
  0x15   : > { %p575_p4 = scmp.eq.s32.totalorder %s2684_s2, 1  ;;  %p2687_p7 = scmp.ge.s32.totalorder %s3308_s28, 1 }
  0x16   : > { %s3484_s30 = scalar_select %p556_p1, %s3304_s27, %s558_s0  }
  0x17   : > { %p3486_p5 = por %p569_p2, %p568_p0  ;;  %p3490_p6 = por %p575_p4, %p574_p3 }
  0x18   : > { %4075 = sst [smem:[#allocation8_spill]] %s3484_s30  ;;  %p673_p8 = scmp.lt.s32.totalorder %s3308_s28, 3 }
  0x19   : > { %s4077_s25 = scalar_select %p3490_p6, 1, 0 }
  0x1a   : > { %p674_p9 = pnand %p2687_p7, %p673_p8 }
  0x1b   : > { %4078 = sst [smem:[#allocation9_spill]] %s4077_s25  ;;  %p742_p10 = scmp.lt.s32.totalorder (!%p674_p9), %s3469_s6, 1  ;;  %v753_v1 = vlaneseq (!%p674_p9)  ;;  %v3310_v4 = vmov (!%p674_p9), 0.0   ;;  %vm3311_vm2 = vmmov (!%p674_p9), 0   ;;  %vm1013_vm3 = vcmask (!%p674_p9), 64512  }
  0x1c   : > { %677 = sbr.rel (%p674_p9) target bundleno = 4335 (0x10ef), region = 116  ;;  %s4079_s0 = sld [smem:[#allocation10_spill]] (!%p674_p9)  ;;  %2871 = vmatprep.subr.bf16.mxu0 (!%p674_p9), %v3310_v4  ;;  %2891 = vmatprep.subr.bf16.mxu1 (!%p674_p9), %v3310_v4  ;;  %vm1080_vm4 = vcmask (!%p674_p9), 1043456   ;;  %vm1474_vm5 = vcmask (!%p674_p9), 130048   ;;  %vm1476_vm6 = vcmask (!%p674_p9), 195584   ;;  %vm1502_vm7 = vcmask (!%p674_p9), 261120  }
  0x1d   : > { %v3506_v2 = vand.u32 (!%p674_p9), 127, %v753_v1  ;;  %v3508_v3 = vshrl.u32 (!%p674_p9), %v753_v1, 7  ;;  %s4080_s29 = sld [smem:[#allocation14_spill]] (!%p674_p9)  ;;  %2887 = vmatprep.mubr.msk.bf16.mxu0 (!%p674_p9), %vm3311_vm2, %v3310_v4  ;;  %2907 = vmatprep.mubr.msk.bf16.mxu1 (!%p674_p9), %vm3311_vm2, %v3310_v4  ;;  %s4082_s30 = sld [smem:[#allocation12_spill]] (!%p674_p9) }
  0x1e   : > { %s4083_s1 = sld [smem:[#allocation13_spill]] (!%p674_p9)  ;;  %s4084_s5 = sld [smem:[#allocation17_spill]] (!%p674_p9) }
  0x1f   : > { %vm758_vm0 = vcmp.gt.s32.totalorder (!%p674_p9), %v3506_v2, %v3508_v3  ;;  %vm755_vm1 = vcmp.lt.s32.totalorder (!%p674_p9), %v3506_v2, 32  ;;  %s4085_s25 = sld [smem:[#allocation15_spill]] (!%p674_p9)  ;;  %s4051_s2 = smov (!%p674_p9), 104   ;;  %v3194_v2 = vld [vmem:[%s4033_s20 + $0x20] sm:$0xff] (!%p674_p9)  }
  0x20   : > { %v3641_v60 = vsel (!%p674_p9), %vm758_vm0, -1e+30, %v3310_v4  ;;  %s4048_s27 = smov (!%p674_p9), 72   ;;  %s4089_s9 = sld [smem:[#allocation19_spill]] (!%p674_p9) }
  0x21   : > { %s4090_s10 = sld [smem:[#allocation20_spill]] (!%p674_p9) }
  0x23   : > { %s3498_s8 = scalar_select %p742_p10, %s3469_s6, 1  ;;  %v3154_v5 = vld [vmem:[%s4080_s29] sm:$0xff]   ;;  %v3156_v7 = vld [vmem:[%s4080_s29 + $0x8] sm:$0xff]   ;;  %v3158_v14 = vld [vmem:[%s4080_s29 + $0x10] sm:$0xff]  }
  0x24   : > { %2872 = vmatpush3.bf16.msra.mxu0 %v3154_v5  ;;  %v3160_v16 = vld [vmem:[%s4080_s29 + $0x18] sm:$0xff]   ;;  %v3162_v18 = vld [vmem:[%s4080_s29 + $0x20] sm:$0xff]   ;;  %v3164_v20 = vld [vmem:[%s4080_s29 + $0x28] sm:$0xff]  }
  0x25   : > { %s4044_s4 = sshll.u32 %s3498_s8, 3  ;;  %2873 = vmatprep.subr.bf16.mxu0 %v3310_v4  ;;  %v3166_v22 = vld [vmem:[%s4080_s29 + $0x30] sm:$0xff]   ;;  %v3168_v24 = vld [vmem:[%s4080_s29 + $0x38] sm:$0xff]   ;;  %v2691_v30 = vld [vmem:[%s4082_s30] ss:$0 sm:$0xff]  ;;  %s4049_s30 = smov 80  }
  0x26   : > { %s745_s7 = scalar_lea.vmem %s4079_s0, %s4044_s4  ;;  %s4081_s0 = sld [smem:[#allocation16_spill]]  ;;  %v2692_v32 = vld [vmem:[%s4083_s1] ss:$0 sm:$0xff] }
  0x27   : > { %v751_v0 = vld [vmem:[%s745_s7] sm:$0xff]  ;;  %s4054_s4 = smov 112   ;;  %s4056_s1 = smov 120  }
  0x28   : > { %760 = vadd.xlane.f32.xlu0 %v751_v0  ;;  %2874 = vmatpush3.bf16.msra.mxu0 %v3156_v7  ;;  %v2702_v36 = vld [vmem:[%s4084_s5] ss:$0 sm:$0xff]  ;;  %s4047_s7 = smov 88   ;;  %s4050_s5 = smov 96  }
  0x29   : > { %2875 = vmatprep.subr.bf16.mxu0 %v3310_v4  ;;  %v2693_v37 = vld [vmem:[%s4085_s25] ss:$0 sm:$0xff]  ;;  %s4053_s25 = smov 8  }
  0x2c   : > { %v3155_v6 = vld [vmem:[%s4081_s0] sm:$0xff]   ;;  %v3157_v8 = vld [vmem:[%s4081_s0 + $0x8] sm:$0xff]   ;;  %v3159_v15 = vld [vmem:[%s4081_s0 + $0x10] sm:$0xff]   ;;  %2876 = vmatpush3.bf16.msra.mxu0 %v3158_v14 }
  0x2d   : > { %2892 = vmatpush3.bf16.msra.mxu1 %v3155_v6  ;;  %2877 = vmatprep.subr.bf16.mxu0 %v3310_v4  ;;  %v3161_v17 = vld [vmem:[%s4081_s0 + $0x18] sm:$0xff]   ;;  %v3163_v19 = vld [vmem:[%s4081_s0 + $0x20] sm:$0xff]   ;;  %v3165_v21 = vld [vmem:[%s4081_s0 + $0x28] sm:$0xff]  }
  0x2e   : > { %2893 = vmatprep.subr.bf16.mxu1 %v3310_v4  ;;  %v3167_v23 = vld [vmem:[%s4081_s0 + $0x30] sm:$0xff]   ;;  %v3169_v25 = vld [vmem:[%s4081_s0 + $0x38] sm:$0xff]  }
  0x30   : > { %2878 = vmatpush3.bf16.msra.mxu0 %v3160_v16 }
  0x31   : > { %2894 = vmatpush3.bf16.msra.mxu1 %v3157_v8  ;;  %2879 = vmatprep.subr.bf16.mxu0 %v3310_v4 }
  0x32   : > { %2895 = vmatprep.subr.bf16.mxu1 %v3310_v4 }
  0x34   : > { %2880 = vmatpush3.bf16.msra.mxu0 %v3162_v18 }
  0x35   : > { %2896 = vmatpush3.bf16.msra.mxu1 %v3159_v15  ;;  %2881 = vmatprep.subr.bf16.mxu0 %v3310_v4 }
  0x36   : > { %2897 = vmatprep.subr.bf16.mxu1 %v3310_v4 }
  0x38   : > { %2882 = vmatpush3.bf16.msra.mxu0 %v3164_v20 }
  0x39   : > { %2898 = vmatpush3.bf16.msra.mxu1 %v3161_v17  ;;  %2883 = vmatprep.subr.bf16.mxu0 %v3310_v4 }
  0x3a   : > { %2899 = vmatprep.subr.bf16.mxu1 %v3310_v4 }
  0x3c   : > { %2884 = vmatpush3.bf16.msra.mxu0 %v3166_v22 }
  0x3d   : > { %2900 = vmatpush3.bf16.msra.mxu1 %v3163_v19  ;;  %2885 = vmatprep.subr.bf16.mxu0 %v3310_v4 }
  0x3e   : > { %2901 = vmatprep.subr.bf16.mxu1 %v3310_v4 }
  0x40   : > { %2886 = vmatpush3.bf16.msra.mxu0 %v3168_v24 }
  0x41   : > { %2902 = vmatpush3.bf16.msra.mxu1 %v3165_v21  ;;  %2911 = vmatprep.subr.bf16.mxu0 %v3310_v4 }
  0x42   : > { %2903 = vmatprep.subr.bf16.mxu1 %v3310_v4 }
  0x45   : > { %2904 = vmatpush3.bf16.msra.mxu1 %v3167_v23 }
  0x46   : > { %2905 = vmatprep.subr.bf16.mxu1 %v3310_v4 }
  0x49   : > { %2906 = vmatpush3.bf16.msra.mxu1 %v3169_v25 }
  0x4a   : > { %2917 = vmatprep.subr.bf16.mxu1 %v3310_v4 }
  0xb5   : > { %v761_v9 = vpop.xlane.xlu0 %760 }
  0xb6   : > { %v762_v10 = vmul.f32 0.03125, %v761_v9 }
  0xb8   : > { %v763_v11 = vsub.f32 %v751_v0, %v762_v10 }
  0xba   : > { %v764_v12 = vsel %vm755_vm1, %v763_v11, 0.0 }
  0xbb   : > { %v765_v13 = vmul.f32 %v764_v12, %v764_v12 }
  0xbd   : > { %766 = vadd.xlane.f32.xlu0 %v765_v13 }
 0x14a   : > { %v767_v26 = vpop.xlane.xlu0 %766 }
 0x14b   : > { %v768_v27 = vmul.f32 0.03125, %v767_v26 }
 0x14d   : > { %v769_v28 = vadd.f32 1e-05, %v768_v27 }
 0x14f   : > { %3206 = vrsqrt.f32 %v769_v28 }
 0x159   : > { %v3207_v29 = vpop.eup %3206 }
 0x15a   : > { %v771_v31 = vmul.f32 %v3207_v29, %v764_v12 }
 0x15c   : > { %v779_v33 = vmul.f32 %v2691_v30, %v771_v31 }
 0x15e   : > { %v3591_v34 = vadd.f32 %v2692_v32, %v779_v33 }
 0x160   : > { %v788_v35 = vpack.c.bf16 %v3591_v34, %v3591_v34 }
 0x162   : > { %2888 = vmatmul.mubr.bf16.vlgmr.msra.gmra.mrb[0].mxu0 %v788_v35  ;;  %2908 = vmatmul.mubr.bf16.vlgmr.msra.gmra.mrb[0].mxu1 %v788_v35 }
 0x163   : > { %2913 = vmatprep.mubr.msk.bf16.mxu0 %vm3311_vm2, %v3310_v4  ;;  %2919 = vmatprep.mubr.msk.bf16.mxu1 %vm3311_vm2, %v3310_v4 }
 0x235   : > { %v894_v38 = vpop.f32.mrb[0].mxu0  ;;  %v1005_v39 = vpop.f32.mrb[0].mxu1 }
 0x236   : > { %v1006_v40 = vadd.f32 %v2702_v36, %v1005_v39  ;;  %v2889_v41 = vpop.f32.mrb[1].mxu0  ;;  %v2909_v42 = vpop.f32.mrb[1].mxu1  ;;  %v895_v45 = vadd.f32 %v2693_v37, %v894_v38 }
 0x237   : > { %v897_v43 = vpop.f32.mrb[2].mxu0  ;;  %v1008_v44 = vpop.f32.mrb[2].mxu1 }
 0x238   : > { %v3605_v46 = vpack.c.bf16 %v1006_v40, %v1006_v40  ;;  %v2890_v47 = vpop.f32.mrb[3].mxu0  ;;  %v2910_v48 = vpop.f32.mrb[3].mxu1  ;;  %v1011_v50 = vpack.c.bf16 %v895_v45, %v895_v45 }
 0x23a   : > { %1239 = vrot.lane.b32.xlu0 %v3605_v46, %s4054_s4  ;;  %1127 = vrot.lane.b32.xlu1 %v3605_v46, %s4056_s1  ;;  %v1018_v49 = vsel %vm1013_vm3, %v3605_v46, 0 }
 0x23b   : > { %2912 = vmatpush3.bf16.xpose.msra.mxu0 %v1018_v49 }
 0x23c   : > { %2923 = vmatprep.subr.bf16.mxu0 %v3310_v4 }
 0x23e   : > { %1125 = vrot.lane.b32.xlu1 %v1011_v50, %s4056_s1 }
 0x242   : > { %1237 = vrot.lane.b32.xlu1 %v1011_v50, %s4054_s4  ;;  %2914 = vmatmul.mubr.msk.bf16.vlgmr.msra.gmra.mrb[4].mxu0 %vm1013_vm3, %v1011_v50  ;;  %s4088_s4 = sld [smem:[#allocation11_spill]] }
 0x243   : > { %2925 = vmatprep.mubr.msk.bf16.mxu0 %vm3311_vm2, %v3310_v4 }
 0x246   : > { %1351 = vrot.lane.b32.xlu1 %v3605_v46, %s4051_s2 }
 0x24a   : > { %1349 = vrot.lane.b32.xlu1 %v1011_v50, %s4051_s2  ;;  %s4087_s2 = sshll.u32 %s3498_s8, 3  ;;  %s4091_s8 = smov 120  }
 0x24b   : > { %s749_s1 = scalar_lea.vmem %s4088_s4, %s4087_s2  ;;  %s4092_s4 = smov 112  }
 0x24c   : > { %s4098_s2 = smov 8  }
 0x2ac   : > { %v1128_v51 = vpop.permute.xlu1 %1127  ;;  %v1240_v54 = vpop.permute.xlu0 %1239 }
 0x2ad   : > { %v1133_v52 = vsel %vm1013_vm3, %v1128_v51, 0  ;;  %v1245_v56 = vsel %vm1013_vm3, %v1240_v54, 0 }
 0x2ae   : > { %2924 = vmatpush3.bf16.xpose.msra.mxu0 %v1133_v52 }
 0x2af   : > { %2935 = vmatprep.subr.bf16.mxu0 %v3310_v4 }
 0x2b0   : > { %v1126_v53 = vpop.permute.xlu1 %1125 }
 0x2b4   : > { %v1238_v55 = vpop.permute.xlu1 %1237 }
 0x2b5   : > { %2926 = vmatmul.mubr.msk.bf16.vlgmr.msra.gmra.mrb[8].mxu0 %vm1013_vm3, %v1126_v53 }
 0x2b6   : > { %2936 = vmatpush3.bf16.xpose.msra.mxu0 %v1245_v56  ;;  %2937 = vmatprep.mubr.msk.bf16.mxu0 %vm3311_vm2, %v3310_v4 }
 0x2b7   : > { %2947 = vmatprep.subr.bf16.mxu0 %v3310_v4 }
 0x2b8   : > { %v1352_v57 = vpop.permute.xlu1 %1351 }
 0x2b9   : > { %v1357_v58 = vsel %vm1013_vm3, %v1352_v57, 0 }
 0x2bc   : > { %v1350_v59 = vpop.permute.xlu1 %1349 }
 0x2bd   : > { %2938 = vmatmul.mubr.msk.bf16.vlgmr.msra.gmra.mrb[12].mxu0 %vm1013_vm3, %v1238_v55 }
 0x2be   : > { %2948 = vmatpush3.bf16.xpose.msra.mxu0 %v1357_v58  ;;  %2949 = vmatprep.mubr.msk.bf16.mxu0 %vm3311_vm2, %v3310_v4 }
 0x2bf   : > { %2959 = vmatprep.subr.bf16.mxu0 %v3310_v4 }
 0x2c5   : > { %2950 = vmatmul.mubr.msk.bf16.vlgmr.msra.gmra.mrb[16].mxu0 %vm1013_vm3, %v1350_v59 }
 0x2c6   : > { %2963 = vmatprep.mubr.msk.bf16.mxu0 %vm3311_vm2, %v3310_v4 }
 0x315   : > { %v1054_v61 = vpop.f32.mrb[4].mxu0 }
 0x316   : > { %v1060_v62 = vmul.f32 0.35355338, %v1054_v61  ;;  %v2915_v63 = vpop.f32.mrb[5].mxu0 }
 0x317   : > { %v1057_v0 = vpop.f32.mrb[6].mxu0 }
 0x318   : > { %v2916_v1 = vpop.f32.mrb[7].mxu0  ;;  %v1061_v5 = vadd.f32 %v1060_v62, %v3641_v60 }
 0x31a   : > { %v1062_v6 = vsel %vm1013_vm3, %v1061_v5, -inf }
 0x31b   : > { %1063 = vmax.xlane.f32.xlu1 %v1062_v6 }
 0x388   : > { %v1169_v7 = vpop.f32.mrb[8].mxu0 }
 0x389   : > { %v1175_v8 = vmul.f32 0.35355338, %v1169_v7  ;;  %v2927_v9 = vpop.f32.mrb[9].mxu0 }
 0x38a   : > { %v1172_v10 = vpop.f32.mrb[10].mxu0 }
 0x38b   : > { %v2928_v11 = vpop.f32.mrb[11].mxu0  ;;  %v1176_v12 = vadd.f32 %v1175_v8, %v3641_v60 }
 0x38d   : > { %v1177_v3 = vsel %vm1013_vm3, %v1176_v12, -inf }
 0x38e   : > { %1178 = vmax.xlane.f32.xlu0 %v1177_v3 }
 0x390   : > { %v1281_v13 = vpop.f32.mrb[12].mxu0 }
 0x391   : > { %v1287_v14 = vmul.f32 0.35355338, %v1281_v13  ;;  %v2939_v15 = vpop.f32.mrb[13].mxu0 }
 0x392   : > { %v1284_v16 = vpop.f32.mrb[14].mxu0 }
 0x393   : > { %v2940_v17 = vpop.f32.mrb[15].mxu0  ;;  %v1288_v18 = vadd.f32 %v1287_v14, %v3641_v60 }
 0x395   : > { %v1289_v19 = vsel %vm1013_vm3, %v1288_v18, -inf }
 0x396   : > { %1290 = vmax.xlane.f32.xlu1 %v1289_v19 }
 0x398   : > { %v1393_v20 = vpop.f32.mrb[16].mxu0 }
 0x399   : > { %v1399_v21 = vmul.f32 0.35355338, %v1393_v20  ;;  %v2951_v22 = vpop.f32.mrb[17].mxu0 }
 0x39a   : > { %v1396_v23 = vpop.f32.mrb[18].mxu0 }
 0x39b   : > { %v2952_v24 = vpop.f32.mrb[19].mxu0  ;;  %v1400_v25 = vadd.f32 %v1399_v21, %v3641_v60 }
 0x39d   : > { %v1401_v26 = vsel %vm1013_vm3, %v1400_v25, -inf }
 0x39e   : > { %1402 = vmax.xlane.f32.xlu1 %v1401_v26 }
 0x3a8   : > { %v1064_v27 = vpop.xlane.xlu1 %1063 }
 0x3a9   : > { %v1065_v28 = vsub.f32 %v1061_v5, %v1064_v27 }
 0x3ab   : > { %v1066_v29 = vmul.f32 1.442695, %v1065_v28 }
 0x3ad   : > { %3208 = vpow2.f32 %v1066_v29  ;;  %v752_v29 = vld [vmem:[%s749_s1] sm:$0xff] }
 0x3b7   : > { %v3209_v30 = vpop.eup %3208 }
 0x3b8   : > { %v1068_v31 = vsel %vm1013_vm3, %v3209_v30, 0.0 }
 0x3b9   : > { %1069 = vadd.xlane.f32.xlu0 %v1068_v31 }
 0x41b   : > { %v1179_v32 = vpop.xlane.xlu0 %1178 }
 0x41c   : > { %v1180_v33 = vsub.f32 %v1176_v12, %v1179_v32 }
 0x41e   : > { %v1181_v35 = vmul.f32 1.442695, %v1180_v33 }
 0x420   : > { %3210 = vpow2.f32 %v1181_v35 }
 0x423   : > { %v1291_v36 = vpop.xlane.xlu1 %1290 }
 0x424   : > { %v1292_v37 = vsub.f32 %v1288_v18, %v1291_v36 }
 0x426   : > { %v1293_v38 = vmul.f32 1.442695, %v1292_v37 }
 0x428   : > { %3212 = vpow2.f32 %v1293_v38 }
 0x42a   : > { %v3211_v39 = vpop.eup %3210 }
 0x42b   : > { %v1183_v40 = vsel %vm1013_vm3, %v3211_v39, 0.0  ;;  %v1403_v43 = vpop.xlane.xlu1 %1402 }
 0x42c   : > { %1184 = vadd.xlane.f32.xlu1 %v1183_v40  ;;  %v1404_v44 = vsub.f32 %v1400_v25, %v1403_v43  ;;  %v3172_v43 = vld [vmem:[%s4027_s14] sm:$0xff]  }
 0x42e   : > { %v1405_v45 = vmul.f32 1.442695, %v1404_v44  ;;  %v3173_v44 = vld [vmem:[%s4027_s14 + $0x8] sm:$0xff]  }
 0x430   : > { %3214 = vpow2.f32 %v1405_v45  ;;  %v3174_v45 = vld [vmem:[%s4027_s14 + $0x10] sm:$0xff]  }
 0x432   : > { %v3213_v41 = vpop.eup %3212 }
 0x433   : > { %v1295_v42 = vsel %vm1013_vm3, %v3213_v41, 0.0 }
 0x434   : > { %1296 = vadd.xlane.f32.xlu0 %v1295_v42 }
 0x43a   : > { %v3215_v47 = vpop.eup %3214 }
 0x43b   : > { %v1407_v48 = vsel %vm1013_vm3, %v3215_v47, 0.0 }
 0x43d   : > { %1189 = vrot.lane.b32.xlu1 %v3605_v46, %s4047_s7  ;;  %s4058_s7 = smov 24  }
 0x446   : > { %v1070_v49 = vpop.xlane.xlu0 %1069 }
 0x447   : > { %3216 = vrcp.f32 %v1070_v49  ;;  %v3177_v49 = vld [vmem:[%s4027_s14 + $0x28] sm:$0xff]  }
 0x44a   : > { %1075 = vrot.lane.b32.xlu0 %v3605_v46, %s4050_s5  ;;  %s4093_s5 = smov 104  }
 0x44e   : > { %1413 = vrot.lane.b32.xlu0 %v3605_v46, %s4048_s27  ;;  %s4096_s27 = smov 72  }
 0x451   : > { %v3217_v51 = vpop.eup %3216 }
 0x452   : > { %v1072_v53 = vmul.f32 %v3217_v51, %v3209_v30  ;;  %v3179_v51 = vld [vmem:[%s4027_s14 + $0x38] sm:$0xff]  }
 0x454   : > { %v1073_v57 = vpack.c.bf16 %v1072_v53, %v1072_v53 }
 0x461   : > { %1408 = vadd.xlane.f32.xlu1 %v1407_v48  ;;  %v3176_v48 = vld [vmem:[%s4027_s14 + $0x20] sm:$0xff]  }
 0x472   : > { %1301 = vrot.lane.b32.xlu1 %v3605_v46, %s4049_s30  ;;  %s4086_s30 = sld [smem:[#allocation18_spill]] }
 0x478   : > { %v3170_v19 = vld [vmem:[%s4086_s30] sm:$0xff]   ;;  %v3171_v20 = vld [vmem:[%s4086_s30 + $0x8] sm:$0xff]  }
 0x479   : > { %2960 = vmatpush3.bf16.msra.mxu0 %v3170_v19  ;;  %v2734_v19 = vld [vmem:[%s4028_s15] ss:$0 sm:$0xff] }
 0x47a   : > { %2961 = vmatprep.subr.bf16.mxu0 %v3310_v4 }
 0x47d   : > { %2962 = vmatpush3.bf16.msra.mxu0 %v3171_v20 }
 0x47e   : > { %2987 = vmatprep.subr.bf16.mxu0 %v3310_v4 }
 0x4b9   : > { %v1185_v50 = vpop.xlane.xlu1 %1184 }
 0x4ba   : > { %3218 = vrcp.f32 %v1185_v50  ;;  %v3178_v50 = vld [vmem:[%s4027_s14 + $0x30] sm:$0xff]  }
 0x4bd   : > { %v1190_v56 = vpop.permute.xlu1 %1189 }
 0x4be   : > { %v1195_v59 = vsel %vm1080_vm4, %v1190_v56, 0 }
 0x4c1   : > { %v1297_v52 = vpop.xlane.xlu0 %1296 }
 0x4c2   : > { %3220 = vrcp.f32 %v1297_v52 }
 0x4c4   : > { %v3219_v58 = vpop.eup %3218 }
 0x4c5   : > { %v1076_v54 = vpop.permute.xlu0 %1075  ;;  %v1187_v46 = vmul.f32 %v3219_v58, %v3211_v39 }
 0x4c6   : > { %v1082_v55 = vsel %vm1080_vm4, %v1076_v54, 0 }
 0x4c7   : > { %2918 = vmatpush3.bf16.msra.mxu1 %v1082_v55  ;;  %v1188_v61 = vpack.c.bf16 %v1187_v46, %v1187_v46  ;;  %v2719_v55 = vld [vmem:[%s4089_s9] ss:$0 sm:$0xff] }
 0x4c8   : > { %2929 = vmatprep.subr.bf16.mxu1 %v3310_v4 }
 0x4c9   : > { %v1414_v6 = vpop.permute.xlu0 %1413 }
 0x4ca   : > { %2920 = vmatmul.mubr.msk.bf16.vlgmr.msra.gmra.mrb[4].mxu1 %vm1013_vm3, %v1073_v57  ;;  %v1419_v8 = vsel %vm1080_vm4, %v1414_v6, 0 }
 0x4cb   : > { %2930 = vmatpush3.bf16.msra.mxu1 %v1195_v59  ;;  %2931 = vmatprep.mubr.msk.bf16.mxu1 %vm3311_vm2, %v3310_v4 }
 0x4cc   : > { %2941 = vmatprep.subr.bf16.mxu1 %v3310_v4  ;;  %v3221_v62 = vpop.eup %3220 }
 0x4cd   : > { %v1299_v0 = vmul.f32 %v3221_v62, %v3213_v41 }
 0x4cf   : > { %v1300_v7 = vpack.c.bf16 %v1299_v0, %v1299_v0  ;;  %v2723_v0 = vld [vmem:[%s4090_s10] ss:$0 sm:$0xff] }
 0x4d2   : > { %2932 = vmatmul.mubr.msk.bf16.vlgmr.msra.gmra.mrb[8].mxu1 %vm1013_vm3, %v1188_v61 }
 0x4d3   : > { %2943 = vmatprep.mubr.msk.bf16.mxu1 %vm3311_vm2, %v3310_v4 }
 0x4ee   : > { %v1409_v63 = vpop.xlane.xlu1 %1408 }
 0x4ef   : > { %3222 = vrcp.f32 %v1409_v63 }
 0x4f2   : > { %v1302_v1 = vpop.permute.xlu1 %1301 }
 0x4f3   : > { %v1307_v5 = vsel %vm1080_vm4, %v1302_v1, 0 }
 0x4f4   : > { %2942 = vmatpush3.bf16.msra.mxu1 %v1307_v5  ;;  %v2724_v5 = vld [vmem:[%s4024_s11] ss:$0 sm:$0xff] }
 0x4f5   : > { %2953 = vmatprep.subr.bf16.mxu1 %v3310_v4 }
 0x4f7   : > { %2944 = vmatmul.mubr.msk.bf16.vlgmr.msra.gmra.mrb[12].mxu1 %vm1013_vm3, %v1300_v7 }
 0x4f8   : > { %2954 = vmatpush3.bf16.msra.mxu1 %v1419_v8  ;;  %2955 = vmatprep.mubr.msk.bf16.mxu1 %vm3311_vm2, %v3310_v4  ;;  %v3181_v8 = vld [vmem:[%s4025_s12 + $0x8] sm:$0xff]  }
 0x4f9   : > { %v3223_v9 = vpop.eup %3222  ;;  %2967 = vmatprep.subr.bf16.mxu1 %v3310_v4 }
 0x4fa   : > { %v1411_v10 = vmul.f32 %v3223_v9, %v3215_v47  ;;  %v3175_v47 = vld [vmem:[%s4027_s14 + $0x18] sm:$0xff]  }
 0x4fc   : > { %v1412_v11 = vpack.c.bf16 %v1411_v10, %v1411_v10 }
 0x4ff   : > { %2956 = vmatmul.mubr.msk.bf16.vlgmr.msra.gmra.mrb[16].mxu1 %vm1013_vm3, %v1412_v11 }
 0x500   : > { %2983 = vmatprep.mubr.msk.bf16.mxu1 %vm3311_vm2, %v3310_v4 }
 0x59d   : > { %v1118_v12 = vpop.f32.mrb[4].mxu1 }
 0x59e   : > { %v2921_v3 = vpop.f32.mrb[5].mxu1 }
 0x59f   : > { %v1121_v13 = vpop.f32.mrb[6].mxu1 }
 0x5a0   : > { %v2922_v14 = vpop.f32.mrb[7].mxu1  ;;  %v3182_v13 = vld [vmem:[%s4025_s12 + $0x10] sm:$0xff]  }
 0x5a1   : > { %v3183_v14 = vld [vmem:[%s4025_s12 + $0x18] sm:$0xff]  }
 0x5a5   : > { %v1231_v15 = vpop.f32.mrb[8].mxu1 }
 0x5a6   : > { %1462 = vrot.lane.b32.xlu1 %v1231_v15, %s4053_s25  ;;  %v2933_v16 = vpop.f32.mrb[9].mxu1  ;;  %s4059_s25 = smov 16   ;;  %v3184_v15 = vld [vmem:[%s4025_s12 + $0x20] sm:$0xff]  }
 0x5a7   : > { %v1234_v17 = vpop.f32.mrb[10].mxu1  ;;  %v3185_v16 = vld [vmem:[%s4025_s12 + $0x28] sm:$0xff]  }
 0x5a8   : > { %v2934_v18 = vpop.f32.mrb[11].mxu1  ;;  %v3186_v17 = vld [vmem:[%s4025_s12 + $0x30] sm:$0xff]  }
 0x5a9   : > { %v3187_v18 = vld [vmem:[%s4025_s12 + $0x38] sm:$0xff]  }
 0x5ca   : > { %v1343_v21 = vpop.f32.mrb[12].mxu1 }
 0x5cb   : > { %1466 = vrot.lane.b32.xlu0 %v1343_v21, %s4059_s25  ;;  %v2945_v22 = vpop.f32.mrb[13].mxu1  ;;  %s4094_s25 = smov 96  }
 0x5cc   : > { %v1346_v23 = vpop.f32.mrb[14].mxu1 }
 0x5cd   : > { %v2946_v24 = vpop.f32.mrb[15].mxu1 }
 0x5d2   : > { %v1455_v25 = vpop.f32.mrb[16].mxu1 }
 0x5d3   : > { %1470 = vrot.lane.b32.xlu1 %v1455_v25, %s4058_s7  ;;  %v2957_v26 = vpop.f32.mrb[17].mxu1  ;;  %s4095_s7 = smov 80  }
 0x5d4   : > { %v1458_v27 = vpop.f32.mrb[18].mxu1 }
 0x5d5   : > { %v2958_v28 = vpop.f32.mrb[19].mxu1 }
 0x5ea   : > { %1575 = vadd.xlane.f32.xlu0 %v752_v29 }
 0x618   : > { %v1463_v30 = vpop.permute.xlu1 %1462 }
 0x619   : > { %v1473_v32 = vsel %vm1013_vm3, %v1118_v12, %v1463_v30 }
 0x63d   : > { %v1467_v31 = vpop.permute.xlu0 %1466 }
 0x63e   : > { %v1475_v33 = vsel %vm1474_vm5, %v1473_v32, %v1467_v31 }
 0x645   : > { %v1471_v35 = vpop.permute.xlu1 %1470 }
 0x646   : > { %v1477_v36 = vsel %vm1476_vm6, %v1475_v33, %v1471_v35 }
 0x647   : > { %v1478_v37 = vpack.c.bf16 %v1477_v36, %v1477_v36  ;;  %v2725_v36 = vld [vmem:[%s4026_s13] ss:$0 sm:$0xff] }
 0x649   : > { %2964 = vmatmul.mubr.msk.bf16.vlgmr.msra.gmra.mrb[20].mxu0 %vm1502_vm7, %v1478_v37 }
 0x64a   : > { %3003 = vmatprep.mubr.msk.bf16.mxu0 %vm3311_vm2, %v3310_v4  ;;  %2988 = vmatpush3.bf16.msra.mxu0 %v3172_v43 }
 0x64b   : > { %2989 = vmatprep.subr.bf16.mxu0 %v3310_v4 }
 0x64e   : > { %2990 = vmatpush3.bf16.msra.mxu0 %v3173_v44 }
 0x64f   : > { %2991 = vmatprep.subr.bf16.mxu0 %v3310_v4 }
 0x652   : > { %2992 = vmatpush3.bf16.msra.mxu0 %v3174_v45 }
 0x653   : > { %2993 = vmatprep.subr.bf16.mxu0 %v3310_v4 }
 0x656   : > { %2994 = vmatpush3.bf16.msra.mxu0 %v3175_v47 }
 0x657   : > { %2995 = vmatprep.subr.bf16.mxu0 %v3310_v4 }
 0x65a   : > { %2996 = vmatpush3.bf16.msra.mxu0 %v3176_v48 }
 0x65b   : > { %2997 = vmatprep.subr.bf16.mxu0 %v3310_v4 }
 0x65e   : > { %2998 = vmatpush3.bf16.msra.mxu0 %v3177_v49 }
 0x65f   : > { %2999 = vmatprep.subr.bf16.mxu0 %v3310_v4 }
 0x662   : > { %3000 = vmatpush3.bf16.msra.mxu0 %v3178_v50 }
 0x663   : > { %3001 = vmatprep.subr.bf16.mxu0 %v3310_v4 }
 0x666   : > { %3002 = vmatpush3.bf16.msra.mxu0 %v3179_v51 }
 0x667   : > { %3013 = vmatprep.subr.bf16.mxu0 %v3310_v4 }
 0x677   : > { %v1576_v38 = vpop.xlane.xlu0 %1575 }
 0x678   : > { %v1577_v39 = vmul.f32 0.03125, %v1576_v38 }
 0x67a   : > { %v1578_v40 = vsub.f32 %v752_v29, %v1577_v39 }
 0x67c   : > { %v1579_v41 = vsel %vm755_vm1, %v1578_v40, 0.0 }
 0x67d   : > { %v1580_v42 = vmul.f32 %v1579_v41, %v1579_v41 }
 0x67f   : > { %1581 = vadd.xlane.f32.xlu0 %v1580_v42 }
 0x70c   : > { %v1582_v52 = vpop.xlane.xlu0 %1581 }
 0x70d   : > { %v1583_v53 = vmul.f32 0.03125, %v1582_v52 }
 0x70f   : > { %v1584_v54 = vadd.f32 1e-05, %v1583_v53 }
 0x711   : > { %3224 = vrsqrt.f32 %v1584_v54 }
 0x71b   : > { %v3225_v62 = vpop.eup %3224 }
 0x71c   : > { %v1540_v56 = vpop.f32.mrb[20].mxu0  ;;  %v1586_v63 = vmul.f32 %v3225_v62, %v1579_v41 }
 0x71d   : > { %v1541_v57 = vadd.f32 %v2719_v55, %v1540_v56  ;;  %v2965_v58 = vpop.f32.mrb[21].mxu0 }
 0x71e   : > { %v1543_v59 = vpop.f32.mrb[22].mxu0  ;;  %v1587_v1 = vmul.f32 %v2723_v0, %v1586_v63 }
 0x71f   : > { %v2966_v46 = vpop.f32.mrb[23].mxu0  ;;  %v1546_v61 = vadd.f32 %v1541_v57, %v3591_v34  ;;  %v3180_v34 = vld [vmem:[%s4025_s12] sm:$0xff]  }
 0x720   : > { %v1588_v6 = vadd.f32 %v2724_v5, %v1587_v1  ;;  %2968 = vmatpush3.bf16.msra.mxu1 %v3180_v34 }
 0x721   : > { %1547 = vadd.xlane.f32.xlu1 %v1546_v61  ;;  %2969 = vmatprep.subr.bf16.mxu1 %v3310_v4 }
 0x722   : > { %v1590_v7 = vpack.c.bf16 %v1588_v6, %v1588_v6 }
 0x724   : > { %3004 = vmatmul.mubr.bf16.vlgmr.msra.gmra.mrb[24].mxu0 %v1590_v7  ;;  %2970 = vmatpush3.bf16.msra.mxu1 %v3181_v8 }
 0x725   : > { %3015 = vmatprep.mubr.msk.bf16.mxu0 %vm3311_vm2, %v3310_v4  ;;  %2971 = vmatprep.subr.bf16.mxu1 %v3310_v4 }
 0x728   : > { %2972 = vmatpush3.bf16.msra.mxu1 %v3182_v13 }
 0x729   : > { %2973 = vmatprep.subr.bf16.mxu1 %v3310_v4 }
 0x72c   : > { %2974 = vmatpush3.bf16.msra.mxu1 %v3183_v14 }
 0x72d   : > { %2975 = vmatprep.subr.bf16.mxu1 %v3310_v4 }
 0x730   : > { %2976 = vmatpush3.bf16.msra.mxu1 %v3184_v15 }
 0x731   : > { %2977 = vmatprep.subr.bf16.mxu1 %v3310_v4 }
 0x734   : > { %2978 = vmatpush3.bf16.msra.mxu1 %v3185_v16 }
 0x735   : > { %2979 = vmatprep.subr.bf16.mxu1 %v3310_v4 }
 0x738   : > { %2980 = vmatpush3.bf16.msra.mxu1 %v3186_v17 }
 0x739   : > { %2981 = vmatprep.subr.bf16.mxu1 %v3310_v4 }
 0x73c   : > { %2982 = vmatpush3.bf16.msra.mxu1 %v3187_v18 }
 0x73d   : > { %3007 = vmatprep.subr.bf16.mxu1 %v3310_v4 }
 0x7ae   : > { %v1548_v9 = vpop.xlane.xlu1 %1547 }
 0x7af   : > { %v1549_v10 = vmul.f32 0.03125, %v1548_v9 }
 0x7b1   : > { %v1550_v11 = vsub.f32 %v1546_v61, %v1549_v10 }
 0x7b3   : > { %v1551_v12 = vsel %vm755_vm1, %v1550_v11, 0.0 }
 0x7b4   : > { %v1552_v3 = vmul.f32 %v1551_v12, %v1551_v12 }
 0x7b6   : > { %1553 = vadd.xlane.f32.xlu0 %v1552_v3 }
 0x7f7   : > { %v1807_v20 = vpop.f32.mrb[24].mxu0 }
 0x7f8   : > { %v1808_v21 = vadd.f32 %v2734_v19, %v1807_v20  ;;  %v3005_v22 = vpop.f32.mrb[25].mxu0 }
 0x7f9   : > { %v1810_v23 = vpop.f32.mrb[26].mxu0 }
 0x7fa   : > { %v3788_v24 = vpack.c.bf16 %v1808_v21, %v1808_v21  ;;  %v3006_v25 = vpop.f32.mrb[27].mxu0 }
 0x7fc   : > { %1927 = vrot.lane.b32.xlu1 %v3788_v24, %s4091_s8  ;;  %v1819_v35 = vsel %vm1013_vm3, %v3788_v24, 0 }
 0x800   : > { %2039 = vrot.lane.b32.xlu1 %v3788_v24, %s4092_s4 }
 0x843   : > { %v1554_v26 = vpop.xlane.xlu0 %1553 }
 0x844   : > { %v1555_v27 = vmul.f32 0.03125, %v1554_v26 }
 0x846   : > { %v1556_v28 = vadd.f32 1e-05, %v1555_v27 }
 0x848   : > { %3226 = vrsqrt.f32 %v1556_v28 }
 0x852   : > { %v3227_v29 = vpop.eup %3226 }
 0x853   : > { %v1558_v30 = vmul.f32 %v3227_v29, %v1551_v12 }
 0x855   : > { %v1566_v31 = vmul.f32 %v2723_v0, %v1558_v30 }
 0x857   : > { %v3794_v32 = vadd.f32 %v2724_v5, %v1566_v31 }
 0x859   : > { %v1589_v33 = vpack.c.bf16 %v3794_v32, %v3794_v32 }
 0x85b   : > { %2984 = vmatmul.mubr.bf16.vlgmr.msra.gmra.mrb[20].mxu1 %v1589_v33 }
 0x85c   : > { %3008 = vmatpush3.bf16.xpose.msra.mxu1 %v1819_v35  ;;  %3009 = vmatprep.mubr.msk.bf16.mxu1 %vm3311_vm2, %v3310_v4 }
 0x85d   : > { %3019 = vmatprep.subr.bf16.mxu1 %v3310_v4 }
 0x86e   : > { %v1928_v43 = vpop.permute.xlu1 %1927 }
 0x86f   : > { %v1933_v44 = vsel %vm1013_vm3, %v1928_v43, 0 }
 0x872   : > { %v2040_v45 = vpop.permute.xlu1 %2039 }
 0x873   : > { %v2045_v48 = vsel %vm1013_vm3, %v2040_v45, 0 }
 0x92e   : > { %v1696_v37 = vpop.f32.mrb[20].mxu1 }
 0x92f   : > { %v1697_v38 = vadd.f32 %v2725_v36, %v1696_v37  ;;  %v2985_v39 = vpop.f32.mrb[21].mxu1 }
 0x930   : > { %v1699_v40 = vpop.f32.mrb[22].mxu1 }
 0x931   : > { %v1813_v41 = vpack.c.bf16 %v1697_v38, %v1697_v38  ;;  %v2986_v42 = vpop.f32.mrb[23].mxu1 }
 0x933   : > { %1925 = vrot.lane.b32.xlu0 %v1813_v41, %s4091_s8  ;;  %2037 = vrot.lane.b32.xlu1 %v1813_v41, %s4092_s4  ;;  %s4097_s8 = smov 88  }
 0x934   : > { %3010 = vmatmul.mubr.msk.bf16.vlgmr.msra.gmra.mrb[24].mxu1 %vm1013_vm3, %v1813_v41 }
 0x935   : > { %3020 = vmatpush3.bf16.xpose.msra.mxu1 %v1933_v44  ;;  %3021 = vmatprep.mubr.msk.bf16.mxu1 %vm3311_vm2, %v3310_v4 }
 0x936   : > { %3031 = vmatprep.subr.bf16.mxu1 %v3310_v4 }
 0x937   : > { %2151 = vrot.lane.b32.xlu0 %v3788_v24, %s4093_s5  ;;  %2149 = vrot.lane.b32.xlu1 %v1813_v41, %s4093_s5  ;;  %s2776_s5 = sshll.u32 %s3469_s6, 7 }
 0x938   : > { %s3971_s9 = scalar_lea.hbm %s4037_s24, %s2776_s5 }
 0x9a5   : > { %v1926_v47 = vpop.permute.xlu0 %1925  ;;  %v2038_v50 = vpop.permute.xlu1 %2037 }
 0x9a6   : > { %3022 = vmatmul.mubr.msk.bf16.vlgmr.msra.gmra.mrb[28].mxu1 %vm1013_vm3, %v1926_v47 }
 0x9a7   : > { %3032 = vmatpush3.bf16.xpose.msra.mxu1 %v2045_v48  ;;  %3033 = vmatprep.mubr.msk.bf16.mxu1 %vm3311_vm2, %v3310_v4 }
 0x9a8   : > { %3043 = vmatprep.subr.bf16.mxu1 %v3310_v4 }
 0x9a9   : > { %v2152_v49 = vpop.permute.xlu0 %2151  ;;  %v2150_v52 = vpop.permute.xlu1 %2149 }
 0x9aa   : > { %v2157_v51 = vsel %vm1013_vm3, %v2152_v49, 0 }
 0x9ae   : > { %3034 = vmatmul.mubr.msk.bf16.vlgmr.msra.gmra.mrb[32].mxu1 %vm1013_vm3, %v2038_v50 }
 0x9af   : > { %3044 = vmatpush3.bf16.xpose.msra.mxu1 %v2157_v51  ;;  %3045 = vmatprep.mubr.msk.bf16.mxu1 %vm3311_vm2, %v3310_v4 }
 0x9b0   : > { %3055 = vmatprep.subr.bf16.mxu1 %v3310_v4 }
 0x9b6   : > { %3046 = vmatmul.mubr.msk.bf16.vlgmr.msra.gmra.mrb[36].mxu1 %vm1013_vm3, %v2150_v52 }
 0x9b7   : > { %3059 = vmatprep.mubr.msk.bf16.mxu1 %vm3311_vm2, %v3310_v4 }
 0xa07   : > { %v1855_v53 = vpop.f32.mrb[24].mxu1 }
 0xa08   : > { %v1861_v54 = vmul.f32 0.35355338, %v1855_v53  ;;  %v3011_v55 = vpop.f32.mrb[25].mxu1 }
 0xa09   : > { %v1858_v56 = vpop.f32.mrb[26].mxu1 }
 0xa0a   : > { %v3012_v57 = vpop.f32.mrb[27].mxu1  ;;  %v1862_v58 = vadd.f32 %v1861_v54, %v3641_v60 }
 0xa0c   : > { %v1863_v59 = vsel %vm1013_vm3, %v1862_v58, -inf }
 0xa0d   : > { %1864 = vmax.xlane.f32.xlu0 %v1863_v59 }
 0xa79   : > { %v1969_v46 = vpop.f32.mrb[28].mxu1 }
 0xa7a   : > { %v1975_v61 = vmul.f32 0.35355338, %v1969_v46  ;;  %v3023_v62 = vpop.f32.mrb[29].mxu1 }
 0xa7b   : > { %v1972_v63 = vpop.f32.mrb[30].mxu1 }
 0xa7c   : > { %v3024_v0 = vpop.f32.mrb[31].mxu1  ;;  %v1976_v1 = vadd.f32 %v1975_v61, %v3641_v60 }
 0xa7e   : > { %v1977_v5 = vsel %vm1013_vm3, %v1976_v1, -inf }
 0xa7f   : > { %1978 = vmax.xlane.f32.xlu1 %v1977_v5 }
 0xa81   : > { %v2081_v6 = vpop.f32.mrb[32].mxu1 }
 0xa82   : > { %v2087_v7 = vmul.f32 0.35355338, %v2081_v6  ;;  %v3035_v34 = vpop.f32.mrb[33].mxu1 }
 0xa83   : > { %v2084_v8 = vpop.f32.mrb[34].mxu1 }
 0xa84   : > { %v3036_v9 = vpop.f32.mrb[35].mxu1  ;;  %v2088_v10 = vadd.f32 %v2087_v7, %v3641_v60  ;;  %v3188_v7 = vld [vmem:[%s4029_s16] sm:$0xff]  }
 0xa85   : > { %3056 = vmatpush3.bf16.msra.mxu1 %v3188_v7 }
 0xa86   : > { %v2089_v11 = vsel %vm1013_vm3, %v2088_v10, -inf  ;;  %3057 = vmatprep.subr.bf16.mxu1 %v3310_v4 }
 0xa87   : > { %2090 = vmax.xlane.f32.xlu0 %v2089_v11  ;;  %v3189_v11 = vld [vmem:[%s4029_s16 + $0x8] sm:$0xff]  }
 0xa89   : > { %v2193_v12 = vpop.f32.mrb[36].mxu1  ;;  %3058 = vmatpush3.bf16.msra.mxu1 %v3189_v11 }
 0xa8a   : > { %v2199_v3 = vmul.f32 0.35355338, %v2193_v12  ;;  %v3047_v13 = vpop.f32.mrb[37].mxu1  ;;  %3083 = vmatprep.subr.bf16.mxu1 %v3310_v4 }
 0xa8b   : > { %v2196_v14 = vpop.f32.mrb[38].mxu1 }
 0xa8c   : > { %v3048_v15 = vpop.f32.mrb[39].mxu1  ;;  %v2200_v16 = vadd.f32 %v2199_v3, %v3641_v60 }
 0xa8e   : > { %v2201_v17 = vsel %vm1013_vm3, %v2200_v16, -inf }
 0xa8f   : > { %2202 = vmax.xlane.f32.xlu0 %v2201_v17 }
 0xa9a   : > { %v1865_v18 = vpop.xlane.xlu0 %1864 }
 0xa9b   : > { %v1866_v19 = vsub.f32 %v1862_v58, %v1865_v18 }
 0xa9d   : > { %v1867_v20 = vmul.f32 1.442695, %v1866_v19 }
 0xa9f   : > { %3228 = vpow2.f32 %v1867_v20 }
 0xaa9   : > { %v3229_v21 = vpop.eup %3228 }
 0xaaa   : > { %v1869_v22 = vsel %vm1013_vm3, %v3229_v21, 0.0 }
 0xaab   : > { %1870 = vadd.xlane.f32.xlu1 %v1869_v22 }
 0xabc   : > { %1876 = vrot.lane.b32.xlu1 %v3788_v24, %s4094_s25 }
 0xb0c   : > { %v1979_v23 = vpop.xlane.xlu1 %1978 }
 0xb0d   : > { %v1980_v25 = vsub.f32 %v1976_v1, %v1979_v23 }
 0xb0f   : > { %v1981_v26 = vmul.f32 1.442695, %v1980_v25 }
 0xb11   : > { %3230 = vpow2.f32 %v1981_v26 }
 0xb14   : > { %v2091_v27 = vpop.xlane.xlu0 %2090 }
 0xb15   : > { %v2092_v60 = vsub.f32 %v2088_v10, %v2091_v27  ;;  %v2751_v27 = vld [vmem:[%s4030_s17] ss:$0 sm:$0xff] }
 0xb17   : > { %v2093_v28 = vmul.f32 1.442695, %v2092_v60 }
 0xb19   : > { %3232 = vpow2.f32 %v2093_v28 }
 0xb1b   : > { %v3231_v29 = vpop.eup %3230 }
 0xb1c   : > { %v2203_v30 = vpop.xlane.xlu0 %2202  ;;  %v1983_v31 = vsel %vm1013_vm3, %v3231_v29, 0.0 }
 0xb1d   : > { %v2204_v33 = vsub.f32 %v2200_v16, %v2203_v30  ;;  %1984 = vadd.xlane.f32.xlu0 %v1983_v31 }
 0xb1f   : > { %v2205_v35 = vmul.f32 1.442695, %v2204_v33 }
 0xb21   : > { %3234 = vpow2.f32 %v2205_v35  ;;  %v3190_v35 = vld [vmem:[%s4033_s20] sm:$0xff]  }
 0xb23   : > { %v3233_v36 = vpop.eup %3232 }
 0xb24   : > { %v2095_v37 = vsel %vm1013_vm3, %v3233_v36, 0.0 }
 0xb25   : > { %2096 = vadd.xlane.f32.xlu1 %v2095_v37 }
 0xb2b   : > { %v3235_v38 = vpop.eup %3234 }
 0xb2c   : > { %v2207_v39 = vsel %vm1013_vm3, %v3235_v38, 0.0 }
 0xb2d   : > { %2208 = vadd.xlane.f32.xlu0 %v2207_v39 }
 0xb36   : > { %2101 = vrot.lane.b32.xlu1 %v3788_v24, %s4095_s7  ;;  %s4099_s7 = smov 16  }
 0xb38   : > { %v1871_v40 = vpop.xlane.xlu1 %1870 }
 0xb39   : > { %3236 = vrcp.f32 %v1871_v40 }
 0xb3a   : > { %2213 = vrot.lane.b32.xlu1 %v3788_v24, %s4096_s27  ;;  %s4100_s27 = smov 24  }
 0xb3c   : > { %v1877_v41 = vpop.permute.xlu1 %1876 }
 0xb3d   : > { %v1882_v42 = vsel %vm1080_vm4, %v1877_v41, 0  ;;  %v3192_v41 = vld [vmem:[%s4033_s20 + $0x10] sm:$0xff]  }
 0xb3e   : > { %3014 = vmatpush3.bf16.msra.mxu0 %v1882_v42  ;;  %v3193_v42 = vld [vmem:[%s4033_s20 + $0x18] sm:$0xff]  }
 0xb3f   : > { %3025 = vmatprep.subr.bf16.mxu0 %v3310_v4 }
 0xb43   : > { %v3237_v43 = vpop.eup %3236  ;;  %1989 = vrot.lane.b32.xlu0 %v3788_v24, %s4097_s8  ;;  %s739_s8 = sand.u32 1, %s3300_s26  }
 0xb44   : > { %v1873_v44 = vmul.f32 %v3237_v43, %v3229_v21  ;;  %v3195_v43 = vld [vmem:[%s4033_s20 + $0x28] sm:$0xff]   ;;  %s2688_s4 = sshll.u32 %s739_s8, 3  ;;  %s2600_s1 = scalar_lea.sflag [#allocation3], %s739_s8 }
 0xb45   : > { %s741_s25 = scalar_lea.vmem [#allocation2], %s2688_s4  ;;  %s3322_s4 = smov [#allocation2]  }
 0xb46   : > { %v1874_v45 = vpack.c.bf16 %v1873_v44, %v1873_v44  ;;  %v3196_v44 = vld [vmem:[%s4033_s20 + $0x30] sm:$0xff]  }
 0xb48   : > { %3016 = vmatmul.mubr.msk.bf16.vlgmr.msra.gmra.mrb[28].mxu0 %vm1013_vm3, %v1874_v45  ;;  %v3197_v45 = vld [vmem:[%s4033_s20 + $0x38] sm:$0xff]  }
 0xb49   : > { %3027 = vmatprep.mubr.msk.bf16.mxu0 %vm3311_vm2, %v3310_v4 }
 0xbaa   : > { %v1985_v47 = vpop.xlane.xlu0 %1984 }
 0xbab   : > { %3238 = vrcp.f32 %v1985_v47  ;;  %v3198_v47 = vld [vmem:[%s4035_s22] sm:$0xff]  }
 0xbb2   : > { %v2097_v48 = vpop.xlane.xlu1 %2096 }
 0xbb3   : > { %3240 = vrcp.f32 %v2097_v48  ;;  %v3199_v48 = vld [vmem:[%s4035_s22 + $0x8] sm:$0xff]  }
 0xbb5   : > { %v3239_v49 = vpop.eup %3238 }
 0xbb6   : > { %v1987_v51 = vmul.f32 %v3239_v49, %v3231_v29  ;;  %v2102_v54 = vpop.permute.xlu1 %2101  ;;  %v3200_v49 = vld [vmem:[%s4035_s22 + $0x10] sm:$0xff]  }
 0xbb7   : > { %v2107_v56 = vsel %vm1080_vm4, %v2102_v54, 0 }
 0xbb8   : > { %v1988_v24 = vpack.c.bf16 %v1987_v51, %v1987_v51  ;;  %v3202_v51 = vld [vmem:[%s4035_s22 + $0x20] sm:$0xff]  }
 0xbba   : > { %v2209_v50 = vpop.xlane.xlu0 %2208  ;;  %v2214_v58 = vpop.permute.xlu1 %2213 }
 0xbbb   : > { %3242 = vrcp.f32 %v2209_v50  ;;  %v2219_v61 = vsel %vm1080_vm4, %v2214_v58, 0  ;;  %v3201_v50 = vld [vmem:[%s4035_s22 + $0x18] sm:$0xff]   ;;  %v2756_v58 = vld [vmem:[%s4032_s19] ss:$0 sm:$0xff] }
 0xbbd   : > { %v3241_v55 = vpop.eup %3240 }
 0xbbe   : > { %v1990_v52 = vpop.permute.xlu0 %1989  ;;  %v2099_v57 = vmul.f32 %v3241_v55, %v3233_v36  ;;  %v3191_v36 = vld [vmem:[%s4033_s20 + $0x8] sm:$0xff]  }
 0xbbf   : > { %v1995_v53 = vsel %vm1080_vm4, %v1990_v52, 0  ;;  %v3203_v52 = vld [vmem:[%s4035_s22 + $0x28] sm:$0xff]  }
 0xbc0   : > { %3026 = vmatpush3.bf16.msra.mxu0 %v1995_v53  ;;  %v2100_v59 = vpack.c.bf16 %v2099_v57, %v2099_v57 }
 0xbc1   : > { %3037 = vmatprep.subr.bf16.mxu0 %v3310_v4 }
 0xbc3   : > { %3028 = vmatmul.mubr.msk.bf16.vlgmr.msra.gmra.mrb[32].mxu0 %vm1013_vm3, %v1988_v24 }
 0xbc4   : > { %3038 = vmatpush3.bf16.msra.mxu0 %v2107_v56  ;;  %3039 = vmatprep.mubr.msk.bf16.mxu0 %vm3311_vm2, %v3310_v4  ;;  %v2755_v56 = vld [vmem:[%s4031_s18] ss:$0 sm:$0xff] }
 0xbc5   : > { %3049 = vmatprep.subr.bf16.mxu0 %v3310_v4  ;;  %v3243_v46 = vpop.eup %3242 }
 0xbc6   : > { %v2211_v62 = vmul.f32 %v3243_v46, %v3235_v38 }
 0xbc8   : > { %v2212_v63 = vpack.c.bf16 %v2211_v62, %v2211_v62  ;;  %v3204_v62 = vld [vmem:[%s4035_s22 + $0x30] sm:$0xff]  }
 0xbcb   : > { %3040 = vmatmul.mubr.msk.bf16.vlgmr.msra.gmra.mrb[36].mxu0 %vm1013_vm3, %v2100_v59 }
 0xbcc   : > { %3050 = vmatpush3.bf16.msra.mxu0 %v2219_v61  ;;  %3051 = vmatprep.mubr.msk.bf16.mxu0 %vm3311_vm2, %v3310_v4 }
 0xbcd   : > { %3063 = vmatprep.subr.bf16.mxu0 %v3310_v4 }
 0xbd3   : > { %3052 = vmatmul.mubr.msk.bf16.vlgmr.msra.gmra.mrb[40].mxu0 %vm1013_vm3, %v2212_v63  ;;  %v3205_v63 = vld [vmem:[%s4035_s22 + $0x38] sm:$0xff]  }
 0xbd4   : > { %3079 = vmatprep.mubr.msk.bf16.mxu0 %vm3311_vm2, %v3310_v4  ;;  %3064 = vmatpush3.bf16.msra.mxu0 %v3190_v35 }
 0xbd5   : > { %3065 = vmatprep.subr.bf16.mxu0 %v3310_v4 }
 0xbd8   : > { %3066 = vmatpush3.bf16.msra.mxu0 %v3191_v36 }
 0xbd9   : > { %3067 = vmatprep.subr.bf16.mxu0 %v3310_v4 }
 0xbdc   : > { %3068 = vmatpush3.bf16.msra.mxu0 %v3192_v41 }
 0xbdd   : > { %3069 = vmatprep.subr.bf16.mxu0 %v3310_v4 }
 0xbe0   : > { %3070 = vmatpush3.bf16.msra.mxu0 %v3193_v42 }
 0xbe1   : > { %3071 = vmatprep.subr.bf16.mxu0 %v3310_v4 }
 0xbe4   : > { %3072 = vmatpush3.bf16.msra.mxu0 %v3194_v2 }
 0xbe5   : > { %3073 = vmatprep.subr.bf16.mxu0 %v3310_v4 }
 0xbe8   : > { %3074 = vmatpush3.bf16.msra.mxu0 %v3195_v43 }
 0xbe9   : > { %3075 = vmatprep.subr.bf16.mxu0 %v3310_v4 }
 0xbec   : > { %3076 = vmatpush3.bf16.msra.mxu0 %v3196_v44 }
 0xbed   : > { %3077 = vmatprep.subr.bf16.mxu0 %v3310_v4 }
 0xbf0   : > { %3078 = vmatpush3.bf16.msra.mxu0 %v3197_v45 }
 0xc1b   : > { %v1918_v0 = vpop.f32.mrb[28].mxu0 }
 0xc1c   : > { %v3017_v1 = vpop.f32.mrb[29].mxu0 }
 0xc1d   : > { %v1921_v5 = vpop.f32.mrb[30].mxu0 }
 0xc1e   : > { %v3018_v6 = vpop.f32.mrb[31].mxu0 }
 0xc96   : > { %v2031_v34 = vpop.f32.mrb[32].mxu0 }
 0xc97   : > { %2262 = vrot.lane.b32.xlu0 %v2031_v34, %s4098_s2  ;;  %v3029_v8 = vpop.f32.mrb[33].mxu0  ;;  %s3250_s2 = sshll.u32 %s3322_s4, 4  ;;  %s3251_s2 = int_to_ptr.vmem [resolvable:$false] %s3250_s2 }
 0xc98   : > { %v2034_v9 = vpop.f32.mrb[34].mxu0  ;;  %s3252_s10 = scalar_lea.vmem %s3251_s2, 256 }
 0xc99   : > { %v3030_v10 = vpop.f32.mrb[35].mxu0 }
 0xc9e   : > { %v2143_v12 = vpop.f32.mrb[36].mxu0 }
 0xc9f   : > { %2266 = vrot.lane.b32.xlu1 %v2143_v12, %s4099_s7  ;;  %v3041_v3 = vpop.f32.mrb[37].mxu0  ;;  %s2613_s7 = sshll.u32 %s741_s25, 4  ;;  %s3973_s7 = int_to_ptr.vmem [resolvable:$true] %s2613_s7 }
 0xca0   : > { %v2146_v13 = vpop.f32.mrb[38].mxu0  ;;  %s3246_s6 = scalar_lea.vmem %s3973_s7, 128  ;;  %p3253_p0 = scmp.lt.s32.totalorder %s3973_s7, %s3251_s2 }
 0xca1   : > { %v3042_v14 = vpop.f32.mrb[39].mxu0  ;;  %p3247_p11 = scmp.ne.s32.totalorder %s3973_s7, %s3246_s6  ;;  %p3254_p1 = scmp.lt.s32.totalorder %s3252_s10, %s3246_s6 }
 0xca3   : > { %p3248_p12 = pnand %p3247_p11, %p3486_p5  ;;  %p3255_p2 = por %p3254_p1, %p3253_p0 }
 0xca5   : > { %p3249_p13 = pneg %p3248_p12 }
 0xca6   : > { %v2255_v15 = vpop.f32.mrb[40].mxu0 }
 0xca7   : > { %2270 = vrot.lane.b32.xlu0 %v2255_v15, %s4100_s27  ;;  %v3053_v16 = vpop.f32.mrb[41].mxu0  ;;  %p3256_p3 = pnand %p3255_p2, %p3249_p13 }
 0xca8   : > { %v2258_v17 = vpop.f32.mrb[42].mxu0 }
 0xca9   : > { %v3054_v18 = vpop.f32.mrb[43].mxu0 }
 0xd09   : > { %v2263_v19 = vpop.permute.xlu0 %2262 }
 0xd0a   : > { %v2273_v21 = vsel %vm1013_vm3, %v1918_v0, %v2263_v19  ;;  %v2757_v0 = vld [vmem:[%s4034_s21] ss:$0 sm:$0xff] }
 0xd11   : > { %v2267_v20 = vpop.permute.xlu1 %2266 }
 0xd12   : > { %v2274_v22 = vsel %vm1474_vm5, %v2273_v21, %v2267_v20 }
 0xd19   : > { %v2271_v23 = vpop.permute.xlu0 %2270 }
 0xd1a   : > { %v2275_v25 = vsel %vm1476_vm6, %v2274_v22, %v2271_v23 }
 0xd1b   : > { %v2276_v26 = vpack.c.bf16 %v2275_v25, %v2275_v25 }
 0xd1d   : > { %3060 = vmatmul.mubr.msk.bf16.vlgmr.msra.gmra.mrb[40].mxu1 %vm1502_vm7, %v2276_v26 }
 0xd1e   : > { %3099 = vmatprep.mubr.msk.bf16.mxu1 %vm3311_vm2, %v3310_v4  ;;  %3084 = vmatpush3.bf16.msra.mxu1 %v3198_v47 }
 0xd1f   : > { %3085 = vmatprep.subr.bf16.mxu1 %v3310_v4 }
 0xd22   : > { %3086 = vmatpush3.bf16.msra.mxu1 %v3199_v48 }
 0xd23   : > { %3087 = vmatprep.subr.bf16.mxu1 %v3310_v4 }
 0xd26   : > { %3088 = vmatpush3.bf16.msra.mxu1 %v3200_v49 }
 0xd27   : > { %3089 = vmatprep.subr.bf16.mxu1 %v3310_v4 }
 0xd2a   : > { %3090 = vmatpush3.bf16.msra.mxu1 %v3201_v50 }
 0xd2b   : > { %3091 = vmatprep.subr.bf16.mxu1 %v3310_v4 }
 0xd2e   : > { %3092 = vmatpush3.bf16.msra.mxu1 %v3202_v51 }
 0xd2f   : > { %3093 = vmatprep.subr.bf16.mxu1 %v3310_v4 }
 0xd32   : > { %3094 = vmatpush3.bf16.msra.mxu1 %v3203_v52 }
 0xd33   : > { %3095 = vmatprep.subr.bf16.mxu1 %v3310_v4 }
 0xd36   : > { %3096 = vmatpush3.bf16.msra.mxu1 %v3204_v62 }
 0xd37   : > { %3097 = vmatprep.subr.bf16.mxu1 %v3310_v4  ;;  %v2766_v4 = vld [vmem:[%s4036_s23] ss:$0 sm:$0xff] }
 0xd3a   : > { %3098 = vmatpush3.bf16.msra.mxu1 %v3205_v63 }
 0xdf0   : > { %v2337_v60 = vpop.f32.mrb[40].mxu1 }
 0xdf1   : > { %v2338_v28 = vadd.f32 %v2751_v27, %v2337_v60  ;;  %v3061_v29 = vpop.f32.mrb[41].mxu1 }
 0xdf2   : > { %v2340_v30 = vpop.f32.mrb[42].mxu1 }
 0xdf3   : > { %v3062_v31 = vpop.f32.mrb[43].mxu1  ;;  %v2343_v33 = vadd.f32 %v2338_v28, %v3794_v32 }
 0xdf5   : > { %2344 = vadd.xlane.f32.xlu1 %v2343_v33 }
 0xe82   : > { %v2345_v37 = vpop.xlane.xlu1 %2344 }
 0xe83   : > { %v2346_v38 = vmul.f32 0.03125, %v2345_v37 }
 0xe85   : > { %v2347_v39 = vsub.f32 %v2343_v33, %v2346_v38 }
 0xe87   : > { %v2348_v32 = vsel %vm755_vm1, %v2347_v39, 0.0 }
 0xe88   : > { %v2349_v40 = vmul.f32 %v2348_v32, %v2348_v32 }
 0xe8a   : > { %2350 = vadd.xlane.f32.xlu0 %v2349_v40 }
 0xf17   : > { %v2351_v53 = vpop.xlane.xlu0 %2350 }
 0xf18   : > { %v2352_v54 = vmul.f32 0.03125, %v2351_v53 }
 0xf1a   : > { %v2353_v24 = vadd.f32 1e-05, %v2352_v54 }
 0xf1c   : > { %3244 = vrsqrt.f32 %v2353_v24 }
 0xf26   : > { %v3245_v55 = vpop.eup %3244 }
 0xf27   : > { %v2355_v57 = vmul.f32 %v3245_v55, %v2348_v32 }
 0xf29   : > { %v2363_v59 = vmul.f32 %v2755_v56, %v2355_v57 }
 0xf2b   : > { %v2371_v46 = vadd.f32 %v2756_v58, %v2363_v59 }
 0xf2d   : > { %v2372_v61 = vpack.c.bf16 %v2371_v46, %v2371_v46 }
 0xf2f   : > { %3080 = vmatmul.mubr.bf16.vlgmr.msra.gmra.mrb[44].mxu0 %v2372_v61 }
0x1002   : > { %v2478_v1 = vpop.f32.mrb[44].mxu0 }
0x1003   : > { %v2479_v5 = vadd.f32 %v2757_v0, %v2478_v1  ;;  %v3081_v6 = vpop.f32.mrb[45].mxu0 }
0x1004   : > { %v2481_v7 = vpop.f32.mrb[46].mxu0 }
0x1005   : > { %v2484_v34 = vmax.f32 %v2479_v5, 0.0  ;;  %v3082_v8 = vpop.f32.mrb[47].mxu0 }
0x1007   : > { %v2485_v9 = vpack.c.bf16 %v2484_v34, %v2484_v34 }
0x1009   : > { %3100 = vmatmul.mubr.bf16.vlgmr.msra.gmra.mrb[44].mxu1 %v2485_v9 }
0x10dc   : > { %v2591_v10 = vpop.f32.mrb[44].mxu1 }
0x10dd   : > { %v2592_v11 = vadd.f32 %v2766_v4, %v2591_v10  ;;  %v3101_v12 = vpop.f32.mrb[45].mxu1 }
0x10de   : > { %v2594_v3 = vpop.f32.mrb[46].mxu1 }
0x10df   : > { %v2597_v13 = vadd.f32 %v2592_v11, %v2371_v46  ;;  %v3102_v14 = vpop.f32.mrb[47].mxu1 }
0x10e1   : > { %2598 = vst [vmem:[%s741_s25] sm:$0xff] %v2597_v13 }
0x10e2   : > { %3259 = shalt.err (!%p3256_p3)
}
0x10e3   : > { %s3260_s0 = scalar_lea.hbm %s3971_s9, 128  ;;  %s3264_s25 = scalar_lea.hbm %s4037_s24, 256 }
0x10e4   : > { %p3261_p4 = scmp.ne.s32.totalorder %s3971_s9, %s3260_s0  ;;  %p3265_p9 = scmp.lt.u32.totalorder %s3971_s9, %s4037_s24 }
0x10e5   : > { %p3266_p10 = scmp.lt.u32.totalorder %s3264_s25, %s3260_s0  ;;  %p3268_p12 = scmp.lt.u32.totalorder %s3260_s0, %s3971_s9 }
0x10e6   : > { %p3262_p7 = pnand %p3261_p4, %p3486_p5 }
0x10e7   : > { %p3267_p11 = por %p3266_p10, %p3265_p9 }
0x10e8   : > { %p3263_p8 = pneg %p3262_p7 }
0x10e9   : > { %p3269_p13 = por %p3268_p12, %p3267_p11 }
0x10eb   : > { %p3270_p0 = pnand %p3269_p13, %p3263_p8 }
0x10ed   : > { %3273 = shalt.err (!%p3270_p0)
}
0x10ee   : > { %3103 = dma.vmem_to_hbm [thread:$0]  (%p3486_p5), %s3973_s7, 128, %s3971_s9, %s2600_s1  }
0x10ef PF: > { %s4101_s10 = sld [smem:[#allocation5_spill]]  ;;  %p3109_p1 = scmp.ge.s32.totalorder %s3308_s28, 2 }
0x10f1   : > { %p3106_p2 = pnand %p3109_p1, %p3490_p6 }
0x10f5   : > { %s2625_s2 = sand.u32 1, %s4101_s10  }
0x10f6   : > { %s2626_s8 = scalar_lea.sflag [#allocation3], %s2625_s2 }
0x10f7   : > { %3291 = dma.done.wait (!%p3106_p2), %s2626_s8, 128  }
0x10f8   : > { %3293 = vsyncadd (!%p3106_p2), %s2626_s8, 4294967168  ;;  %s4103_s28 = sld [smem:[#allocation7_spill]]  ;;  %s4104_s0 = sld [smem:[#allocation6_spill]] }
0x10f9   : > { %s4105_s27 = sld [smem:[#allocation8_spill]]  ;;  %s4106_s5 = smov %s3300_s26 }
0x10fe   : > { %p34_p3 = scmp.ge.s32.totalorder %s4103_s28, 4   ;;  %s4107_s26 = smov %s4104_s0 }
0x1100   :  { %36 = sbr.rel (!%p34_p3) target bundleno = 15 (0xf), region = 154 }
0x1107   :  { %2631 = vsyncpa [#allocation3], 1 }
0x1108   :  { %2633 = vsyncpa [#allocation3 + $0x1], 1 }

</bundles_post_ra>
